<compile_context>
chip_gen: v5e
topology: v5e:2x2
jax: 0.10.0
libtpu: 0.0.40
codegen_flags: <defaults>
</compile_context>

<pallas_src>
import functools

import jax
import jax.numpy as jnp
from jax.experimental import pallas as pl
from jax.experimental.pallas import tpu as pltpu

LANE = 128   # vreg lane width
FOLD = 8     # batch-fold factor: 8 replicas of each 32x32 layer -> 256x256 MXU weight
             # (matches the 256-wide MXU on v6e/v7x; still a >=2x column reduction on v5e)


def _encdec_kernel(x_ref,
                   w1_ref, b1_ref,
                   w2_ref, b2_ref,
                   w34_ref, b34_ref,
                   w5_ref, b5_ref,
                   w6_ref, b6_ref,
                   out_ref,
                   *, fold, n_in, h1):
    """One batch tile in folded layout.

    x_ref   : [n_in*fold, C]  f32   row (f*fold + r) = feature f of batch-replica r
    w1_ref  : [h1*fold, n_in] f32   first layer runs on the VPU (K = n_in is tiny)
    w*_ref  : [out*fold, in*fold] bf16   kron(W^T, I_fold) weights for the MXU
    b*_ref  : [out*fold, 1]   f32
    out_ref : [o_pad*fold, C] f32   lane-dense output tile
    """
    x = x_ref[...]                                            # [n_in*fold, C] f32

    # ---- layer 1 (in -> h1) on the VPU ------------------------------------------
    # MXU cost is per streamed column, so the K=2 matmul would cost as much as a full
    # 32-wide layer; broadcast multiply-adds on the VPU are nearly free instead.
    h = None
    for f in range(n_in):
        grp = x[f * fold:(f + 1) * fold, :]                   # [fold, C] (sublane-aligned)
        grp = jnp.concatenate([grp] * h1, axis=0)             # [h1*fold, C]
        term = w1_ref[:, f:f + 1] * grp
        h = term if h is None else h + term
    h = jnp.maximum(h + b1_ref[...], 0.0)                     # [h1*fold, C] f32

    # ---- remaining layers on the MXU (bf16 inputs, f32 accumulation) -------------
    def mxu_layer(w_ref, b_ref, act, relu):
        y = jnp.dot(w_ref[...], act.astype(jnp.bfloat16),
                    preferred_element_type=jnp.float32) + b_ref[...]
        return jnp.maximum(y, 0.0) if relu else y

    h = mxu_layer(w2_ref, b2_ref, h, True)       # encoder layer 2 + ReLU
    h = mxu_layer(w34_ref, b34_ref, h, True)     # fused (enc-3 -> dec-1) + ReLU
    h = mxu_layer(w5_ref, b5_ref, h, True)       # decoder layer 2 + ReLU
    out = mxu_layer(w6_ref, b6_ref, h, False)    # decoder output, no ReLU

    out_ref[...] = out.astype(out_ref.dtype)     # [o_pad*fold, C], unmasked lane-dense store


def _choose_tile(batch, unit, tb_max):
    """Tile size: multiple of `unit`, as large as possible (few grid steps, amortize
    the ~0.35us/step overhead), but >= 2 grid steps whenever the batch spans more than
    one minimal tile so v7x's two TensorCores both get work."""
    tb_max = max(unit, (int(tb_max) // unit) * unit)
    n_units = pl.cdiv(batch, unit)
    if n_units <= 1:
        return unit
    return min(tb_max, pl.cdiv(n_units, 2) * unit)


def encoder_decoder_forward(x, params, *, tb_max=8192, fold=FOLD):
    """x: [batch, in_features] f32. params: 6 (W, b) tuples, W [in, out], b [1, out].
    Returns pred_risk [batch, ncat] float32."""
    batch, in_features = x.shape
    (w1, b1), (w2, b2), (w3, b3), (w4, b4), (w5, b5), (w6, b6) = params
    h1 = w1.shape[1]
    ncat = w6.shape[1]

    # --- algebraic fusion of the rank-z bottleneck (no ReLU on z, z never returned) ---
    w34 = jnp.asarray(w3) @ jnp.asarray(w4)
    b34 = jnp.asarray(b3) @ jnp.asarray(w4) + jnp.asarray(b4)

    # --- transposed weights W^T [out, in] and biases b^T [out, 1] ---
    w1t, w2t, w34t, w5t, w6t = (jnp.asarray(w).T.astype(jnp.float32)
                                for w in (w1, w2, w34, w5, w6))
    b1t, b2t, b34t, b5t, b6t = (jnp.asarray(b).T.astype(jnp.float32)
                                for b in (b1, b2, b34, b5, b6))

    # pad output features to a full sublane group -> unmasked stores
    o_pad = max(8, pl.cdiv(ncat, 8) * 8)
    w6t = jnp.pad(w6t, ((0, o_pad - ncat), (0, 0)))
    b6t = jnp.pad(b6t, ((0, o_pad - ncat), (0, 0)))

    # --- batch-fold the weights: kron(W^T, I_fold) in bf16 for the MXU layers ---
    eye = jnp.eye(fold, dtype=jnp.float32)
    kron_w = lambda wt: jnp.kron(wt, eye).astype(jnp.bfloat16)
    rep_b = lambda bt: jnp.repeat(bt, fold, axis=0)            # [out*fold, 1] f32

    w1v = jnp.repeat(w1t, fold, axis=0)                        # [h1*fold, in] f32 (VPU layer)
    weights = [w1v, rep_b(b1t),
               kron_w(w2t), rep_b(b2t),
               kron_w(w34t), rep_b(b34t),
               kron_w(w5t), rep_b(b5t),
               kron_w(w6t), rep_b(b6t)]

    # --- batch tiling: tb = fold * cols, cols a multiple of 128 (lane width) ---
    unit = fold * LANE
    tb = _choose_tile(batch, unit, tb_max)
    cols = tb // fold
    n_tiles = pl.cdiv(batch, tb)
    padded = n_tiles * tb

    # single fused relayout: pad + fold x into [in*fold, n_tiles*cols]
    #   x_folded[f*fold + r, t*cols + c] = x[t*tb + r*cols + c, f]
    xp = jnp.pad(x.astype(jnp.float32), ((0, padded - batch), (0, 0)))
    xf = (xp.reshape(n_tiles, fold, cols, in_features)
            .transpose(3, 1, 0, 2)
            .reshape(in_features * fold, n_tiles * cols))

    in_specs = [pl.BlockSpec((in_features * fold, cols), lambda i: (0, i))]
    # full-array blocks, constant index -> weights stay VMEM-resident across grid steps
    in_specs += [pl.BlockSpec(w.shape, lambda i: (0, 0)) for w in weights]

    kernel = functools.partial(_encdec_kernel, fold=fold, n_in=in_features, h1=h1)

    yf = pl.pallas_call(
        kernel,
        out_shape=jax.ShapeDtypeStruct((o_pad * fold, n_tiles * cols), jnp.float32),
        grid=(n_tiles,),
        in_specs=in_specs,
        out_specs=pl.BlockSpec((o_pad * fold, cols), lambda i: (0, i)),
        compiler_params=pltpu.CompilerParams(dimension_semantics=("parallel",)),
    )(xf, *weights)

    # unfold: [o_pad*fold, T*cols] -> [padded, o_pad] -> [batch, ncat]
    y = (yf.reshape(o_pad, fold, n_tiles, cols)
           .transpose(2, 1, 3, 0)
           .reshape(padded, o_pad))
    return y[:batch, :ncat]


def init_params(key, input_size=2, z_dim=2, ncat=4, h_dim=(32, 32)):
    """Deterministic init mimicking nn.Linear's uniform(-1/sqrt(fan_in), 1/sqrt(fan_in))."""
    enc_dims = [input_size] + list(h_dim) + [z_dim]
    dec_dims = [z_dim] + list(h_dim) + [ncat]
    layer_shapes = list(zip(enc_dims[:-1], enc_dims[1:])) + list(zip(dec_dims[:-1], dec_dims[1:]))

    params = []
    for (fan_in, fan_out) in layer_shapes:
        key, kw, kb = jax.random.split(key, 3)
        bound = 1.0 / jnp.sqrt(jnp.float32(fan_in))
        w = jax.random.uniform(kw, (fan_in, fan_out), jnp.float32, -bound, bound)
        b = jax.random.uniform(kb, (1, fan_out), jnp.float32, -bound, bound)
        params.append((w, b))
    return params


def reference_forward(x, params):
    """Pure-JAX unfused reference (matches the PyTorch module exactly, all f32)."""
    h = x
    for i, (w, b) in enumerate(params):
        h = h @ w + b
        if i not in (2, 5):   # no ReLU on encoder output (z) or final output
            h = jnp.maximum(h, 0.0)
    return h


if __name__ == "__main__":
    key = jax.random.PRNGKey(0)
    key, kx, kx2 = jax.random.split(key, 3)

    input_size, z_dim, ncat, h_dim = 2, 2, 4, (32, 32)
    params = init_params(key, input_size, z_dim, ncat, h_dim)

    # small demo batch (single tile, exercises the padding path)
    batch = 8
    x = jax.random.normal(kx, (batch, input_size), jnp.float32)
    out = jax.block_until_ready(encoder_decoder_forward(x, params))
    ref = reference_forward(x, params)
    assert out.shape == (batch, ncat)
    # bf16 MXU inputs + the enc3/dec1 fusion reassociate fp ops -> looser tolerance
    assert jnp.allclose(out, ref, atol=5e-2, rtol=5e-2), "mismatch vs pure-JAX reference"

    # multi-tile batch (2 grid steps + edge padding) to validate the fold/unfold layout
    batch2 = 2100
    x2 = jax.random.normal(kx2, (batch2, input_size), jnp.float32)
    out2 = jax.block_until_ready(encoder_decoder_forward(x2, params))
    ref2 = reference_forward(x2, params)
    assert out2.shape == (batch2, ncat)
    assert jnp.allclose(out2, ref2, atol=5e-2, rtol=5e-2), "mismatch on multi-tile batch"

    print("KERNEL_OK")
</pallas_src>

<mosaic_0001>
module attributes {stable_mosaic.version = 11 : i64} {
  func.func @_encdec_kernel(%arg0: i32, %arg1: memref<16x128xf32, #tpu.memory_space<vmem>>, %arg2: memref<256x2xf32, #tpu.memory_space<vmem>>, %arg3: memref<256x1xf32, #tpu.memory_space<vmem>>, %arg4: memref<256x256xbf16, #tpu.memory_space<vmem>>, %arg5: memref<256x1xf32, #tpu.memory_space<vmem>>, %arg6: memref<256x256xbf16, #tpu.memory_space<vmem>>, %arg7: memref<256x1xf32, #tpu.memory_space<vmem>>, %arg8: memref<256x256xbf16, #tpu.memory_space<vmem>>, %arg9: memref<256x1xf32, #tpu.memory_space<vmem>>, %arg10: memref<64x256xbf16, #tpu.memory_space<vmem>>, %arg11: memref<64x1xf32, #tpu.memory_space<vmem>>, %arg12: memref<64x128xf32, #tpu.memory_space<vmem>>) attributes {dimension_semantics = [#tpu.dimension_semantics<parallel>], iteration_bounds = array<i64: 1>, scalar_prefetch = 0 : i64, scratch_operands = 0 : i64, tpu.core_type = #tpu.core_type<tc>, window_params = [{transform_indices = @transform_0, window_bounds = array<i64: 16, 128>}, {pipeline_mode = #tpu.pipeline_mode<synchronous>, transform_indices = @transform_1, window_bounds = array<i64: 256, 2>}, {pipeline_mode = #tpu.pipeline_mode<synchronous>, transform_indices = @transform_2, window_bounds = array<i64: 256, 1>}, {pipeline_mode = #tpu.pipeline_mode<synchronous>, transform_indices = @transform_3, window_bounds = array<i64: 256, 256>}, {pipeline_mode = #tpu.pipeline_mode<synchronous>, transform_indices = @transform_4, window_bounds = array<i64: 256, 1>}, {pipeline_mode = #tpu.pipeline_mode<synchronous>, transform_indices = @transform_5, window_bounds = array<i64: 256, 256>}, {pipeline_mode = #tpu.pipeline_mode<synchronous>, transform_indices = @transform_6, window_bounds = array<i64: 256, 1>}, {pipeline_mode = #tpu.pipeline_mode<synchronous>, transform_indices = @transform_7, window_bounds = array<i64: 256, 256>}, {pipeline_mode = #tpu.pipeline_mode<synchronous>, transform_indices = @transform_8, window_bounds = array<i64: 256, 1>}, {pipeline_mode = #tpu.pipeline_mode<synchronous>, transform_indices = @transform_9, window_bounds = array<i64: 64, 256>}, {pipeline_mode = #tpu.pipeline_mode<synchronous>, transform_indices = @transform_10, window_bounds = array<i64: 64, 1>}, {transform_indices = @transform_11, window_bounds = array<i64: 64, 128>}]} {
    %c0 = arith.constant 0 : index
    %c0_0 = arith.constant 0 : index
    %0 = vector.load %arg1[%c0, %c0_0] : memref<16x128xf32, #tpu.memory_space<vmem>>, vector<16x128xf32>
    %1 = vector.extract_strided_slice %0 {offsets = [0, 0], sizes = [8, 128], strides = [1, 1]} : vector<16x128xf32> to vector<8x128xf32>
    %2 = tpu.concatenate %1, %1, %1, %1, %1, %1, %1, %1, %1, %1, %1, %1, %1, %1, %1, %1 in 0 : vector<8x128xf32>, vector<8x128xf32>, vector<8x128xf32>, vector<8x128xf32>, vector<8x128xf32>, vector<8x128xf32>, vector<8x128xf32>, vector<8x128xf32>, vector<8x128xf32>, vector<8x128xf32>, vector<8x128xf32>, vector<8x128xf32>, vector<8x128xf32>, vector<8x128xf32>, vector<8x128xf32>, vector<8x128xf32> -> vector<128x128xf32>
    %3 = tpu.concatenate %1, %1, %1, %1, %1, %1, %1, %1, %1, %1, %1, %1, %1, %1, %1, %1 in 0 : vector<8x128xf32>, vector<8x128xf32>, vector<8x128xf32>, vector<8x128xf32>, vector<8x128xf32>, vector<8x128xf32>, vector<8x128xf32>, vector<8x128xf32>, vector<8x128xf32>, vector<8x128xf32>, vector<8x128xf32>, vector<8x128xf32>, vector<8x128xf32>, vector<8x128xf32>, vector<8x128xf32>, vector<8x128xf32> -> vector<128x128xf32>
    %4 = tpu.concatenate %2, %3 in 0 : vector<128x128xf32>, vector<128x128xf32> -> vector<256x128xf32>
    %c0_1 = arith.constant 0 : index
    %c0_2 = arith.constant 0 : index
    %5 = vector.load %arg2[%c0_1, %c0_2] : memref<256x2xf32, #tpu.memory_space<vmem>>, vector<256x1xf32>
    %6 = vector.broadcast %5 : vector<256x1xf32> to vector<256x128xf32>
    %7 = arith.mulf %6, %4 : vector<256x128xf32>
    %8 = vector.extract_strided_slice %0 {offsets = [8, 0], sizes = [8, 128], strides = [1, 1]} : vector<16x128xf32> to vector<8x128xf32>
    %9 = tpu.concatenate %8, %8, %8, %8, %8, %8, %8, %8, %8, %8, %8, %8, %8, %8, %8, %8 in 0 : vector<8x128xf32>, vector<8x128xf32>, vector<8x128xf32>, vector<8x128xf32>, vector<8x128xf32>, vector<8x128xf32>, vector<8x128xf32>, vector<8x128xf32>, vector<8x128xf32>, vector<8x128xf32>, vector<8x128xf32>, vector<8x128xf32>, vector<8x128xf32>, vector<8x128xf32>, vector<8x128xf32>, vector<8x128xf32> -> vector<128x128xf32>
    %10 = tpu.concatenate %8, %8, %8, %8, %8, %8, %8, %8, %8, %8, %8, %8, %8, %8, %8, %8 in 0 : vector<8x128xf32>, vector<8x128xf32>, vector<8x128xf32>, vector<8x128xf32>, vector<8x128xf32>, vector<8x128xf32>, vector<8x128xf32>, vector<8x128xf32>, vector<8x128xf32>, vector<8x128xf32>, vector<8x128xf32>, vector<8x128xf32>, vector<8x128xf32>, vector<8x128xf32>, vector<8x128xf32>, vector<8x128xf32> -> vector<128x128xf32>
    %11 = tpu.concatenate %9, %10 in 0 : vector<128x128xf32>, vector<128x128xf32> -> vector<256x128xf32>
    %c0_3 = arith.constant 0 : index
    %c1 = arith.constant 1 : index
    %12 = vector.load %arg2[%c0_3, %c1] : memref<256x2xf32, #tpu.memory_space<vmem>>, vector<256x1xf32>
    %13 = vector.broadcast %12 : vector<256x1xf32> to vector<256x128xf32>
    %14 = arith.mulf %13, %11 : vector<256x128xf32>
    %15 = arith.addf %7, %14 : vector<256x128xf32>
    %c0_4 = arith.constant 0 : index
    %c0_5 = arith.constant 0 : index
    %16 = vector.load %arg3[%c0_4, %c0_5] : memref<256x1xf32, #tpu.memory_space<vmem>>, vector<256x1xf32>
    %17 = vector.broadcast %16 : vector<256x1xf32> to vector<256x128xf32>
    %18 = arith.addf %15, %17 : vector<256x128xf32>
    %cst = arith.constant 0.000000e+00 : f32
    %19 = vector.broadcast %cst : f32 to vector<256x128xf32>
    %20 = arith.maximumf %18, %19 : vector<256x128xf32>
    %c0_6 = arith.constant 0 : index
    %c0_7 = arith.constant 0 : index
    %21 = vector.load %arg4[%c0_6, %c0_7] : memref<256x256xbf16, #tpu.memory_space<vmem>>, vector<256x256xbf16>
    %22 = arith.truncf %20 : vector<256x128xf32> to vector<256x128xbf16>
    %cst_8 = arith.constant dense<0.000000e+00> : vector<256x128xf32>
    %23 = tpu.matmul %21, %22, %cst_8 {dimension_numbers = #tpu.dot_dimension_numbers<[1], [0], [0], [1], [0, 0, 1, 1], [], []>} : vector<256x256xbf16>, vector<256x128xbf16>, vector<256x128xf32> -> vector<256x128xf32>
    %c0_9 = arith.constant 0 : index
    %c0_10 = arith.constant 0 : index
    %24 = vector.load %arg5[%c0_9, %c0_10] : memref<256x1xf32, #tpu.memory_space<vmem>>, vector<256x1xf32>
    %25 = vector.broadcast %24 : vector<256x1xf32> to vector<256x128xf32>
    %26 = arith.addf %23, %25 : vector<256x128xf32>
    %cst_11 = arith.constant 0.000000e+00 : f32
    %27 = vector.broadcast %cst_11 : f32 to vector<256x128xf32>
    %28 = arith.maximumf %26, %27 : vector<256x128xf32>
    %c0_12 = arith.constant 0 : index
    %c0_13 = arith.constant 0 : index
    %29 = vector.load %arg6[%c0_12, %c0_13] : memref<256x256xbf16, #tpu.memory_space<vmem>>, vector<256x256xbf16>
    %30 = arith.truncf %28 : vector<256x128xf32> to vector<256x128xbf16>
    %cst_14 = arith.constant dense<0.000000e+00> : vector<256x128xf32>
    %31 = tpu.matmul %29, %30, %cst_14 {dimension_numbers = #tpu.dot_dimension_numbers<[1], [0], [0], [1], [0, 0, 1, 1], [], []>} : vector<256x256xbf16>, vector<256x128xbf16>, vector<256x128xf32> -> vector<256x128xf32>
    %c0_15 = arith.constant 0 : index
    %c0_16 = arith.constant 0 : index
    %32 = vector.load %arg7[%c0_15, %c0_16] : memref<256x1xf32, #tpu.memory_space<vmem>>, vector<256x1xf32>
    %33 = vector.broadcast %32 : vector<256x1xf32> to vector<256x128xf32>
    %34 = arith.addf %31, %33 : vector<256x128xf32>
    %cst_17 = arith.constant 0.000000e+00 : f32
    %35 = vector.broadcast %cst_17 : f32 to vector<256x128xf32>
    %36 = arith.maximumf %34, %35 : vector<256x128xf32>
    %c0_18 = arith.constant 0 : index
    %c0_19 = arith.constant 0 : index
    %37 = vector.load %arg8[%c0_18, %c0_19] : memref<256x256xbf16, #tpu.memory_space<vmem>>, vector<256x256xbf16>
    %38 = arith.truncf %36 : vector<256x128xf32> to vector<256x128xbf16>
    %cst_20 = arith.constant dense<0.000000e+00> : vector<256x128xf32>
    %39 = tpu.matmul %37, %38, %cst_20 {dimension_numbers = #tpu.dot_dimension_numbers<[1], [0], [0], [1], [0, 0, 1, 1], [], []>} : vector<256x256xbf16>, vector<256x128xbf16>, vector<256x128xf32> -> vector<256x128xf32>
    %c0_21 = arith.constant 0 : index
    %c0_22 = arith.constant 0 : index
    %40 = vector.load %arg9[%c0_21, %c0_22] : memref<256x1xf32, #tpu.memory_space<vmem>>, vector<256x1xf32>
    %41 = vector.broadcast %40 : vector<256x1xf32> to vector<256x128xf32>
    %42 = arith.addf %39, %41 : vector<256x128xf32>
    %cst_23 = arith.constant 0.000000e+00 : f32
    %43 = vector.broadcast %cst_23 : f32 to vector<256x128xf32>
    %44 = arith.maximumf %42, %43 : vector<256x128xf32>
    %c0_24 = arith.constant 0 : index
    %c0_25 = arith.constant 0 : index
    %45 = vector.load %arg10[%c0_24, %c0_25] : memref<64x256xbf16, #tpu.memory_space<vmem>>, vector<64x256xbf16>
    %46 = arith.truncf %44 : vector<256x128xf32> to vector<256x128xbf16>
    %cst_26 = arith.constant dense<0.000000e+00> : vector<64x128xf32>
    %47 = tpu.matmul %45, %46, %cst_26 {dimension_numbers = #tpu.dot_dimension_numbers<[1], [0], [0], [1], [0, 0, 1, 1], [], []>} : vector<64x256xbf16>, vector<256x128xbf16>, vector<64x128xf32> -> vector<64x128xf32>
    %c0_27 = arith.constant 0 : index
    %c0_28 = arith.constant 0 : index
    %48 = vector.load %arg11[%c0_27, %c0_28] : memref<64x1xf32, #tpu.memory_space<vmem>>, vector<64x1xf32>
    %49 = vector.broadcast %48 : vector<64x1xf32> to vector<64x128xf32>
    %50 = arith.addf %47, %49 : vector<64x128xf32>
    %c0_29 = arith.constant 0 : index
    %c0_30 = arith.constant 0 : index
    %51 = vector.load %arg12[%c0_29, %c0_30] : memref<64x128xf32, #tpu.memory_space<vmem>>, vector<64x128xf32>
    tpu.vector_store %arg12[%c0_29, %c0_30], %50 {strides = array<i32>} : memref<64x128xf32, #tpu.memory_space<vmem>>, vector<64x128xf32>,
    return
  }
  func.func @transform_0(%arg0: i32) -> (i32, i32) {
    %c0_i32 = arith.constant 0 : i32
    %c0_i32_0 = arith.constant 0 : i32
    return %c0_i32, %arg0 : i32, i32
  }
  func.func @transform_1(%arg0: i32) -> (i32, i32) {
    %c0_i32 = arith.constant 0 : i32
    %c0_i32_0 = arith.constant 0 : i32
    %c0_i32_1 = arith.constant 0 : i32
    return %c0_i32, %c0_i32_0 : i32, i32
  }
  func.func @transform_2(%arg0: i32) -> (i32, i32) {
    %c0_i32 = arith.constant 0 : i32
    %c0_i32_0 = arith.constant 0 : i32
    %c0_i32_1 = arith.constant 0 : i32
    return %c0_i32, %c0_i32_0 : i32, i32
  }
  func.func @transform_3(%arg0: i32) -> (i32, i32) {
    %c0_i32 = arith.constant 0 : i32
    %c0_i32_0 = arith.constant 0 : i32
    %c0_i32_1 = arith.constant 0 : i32
    return %c0_i32, %c0_i32_0 : i32, i32
  }
  func.func @transform_4(%arg0: i32) -> (i32, i32) {
    %c0_i32 = arith.constant 0 : i32
    %c0_i32_0 = arith.constant 0 : i32
    %c0_i32_1 = arith.constant 0 : i32
    return %c0_i32, %c0_i32_0 : i32, i32
  }
  func.func @transform_5(%arg0: i32) -> (i32, i32) {
    %c0_i32 = arith.constant 0 : i32
    %c0_i32_0 = arith.constant 0 : i32
    %c0_i32_1 = arith.constant 0 : i32
    return %c0_i32, %c0_i32_0 : i32, i32
  }
  func.func @transform_6(%arg0: i32) -> (i32, i32) {
    %c0_i32 = arith.constant 0 : i32
    %c0_i32_0 = arith.constant 0 : i32
    %c0_i32_1 = arith.constant 0 : i32
    return %c0_i32, %c0_i32_0 : i32, i32
  }
  func.func @transform_7(%arg0: i32) -> (i32, i32) {
    %c0_i32 = arith.constant 0 : i32
    %c0_i32_0 = arith.constant 0 : i32
    %c0_i32_1 = arith.constant 0 : i32
    return %c0_i32, %c0_i32_0 : i32, i32
  }
  func.func @transform_8(%arg0: i32) -> (i32, i32) {
    %c0_i32 = arith.constant 0 : i32
    %c0_i32_0 = arith.constant 0 : i32
    %c0_i32_1 = arith.constant 0 : i32
    return %c0_i32, %c0_i32_0 : i32, i32
  }
  func.func @transform_9(%arg0: i32) -> (i32, i32) {
    %c0_i32 = arith.constant 0 : i32
    %c0_i32_0 = arith.constant 0 : i32
    %c0_i32_1 = arith.constant 0 : i32
    return %c0_i32, %c0_i32_0 : i32, i32
  }
  func.func @transform_10(%arg0: i32) -> (i32, i32) {
    %c0_i32 = arith.constant 0 : i32
    %c0_i32_0 = arith.constant 0 : i32
    %c0_i32_1 = arith.constant 0 : i32
    return %c0_i32, %c0_i32_0 : i32, i32
  }
  func.func @transform_11(%arg0: i32) -> (i32, i32) {
    %c0_i32 = arith.constant 0 : i32
    %c0_i32_0 = arith.constant 0 : i32
    return %c0_i32, %arg0 : i32, i32
  }
}

</mosaic_0001>

<bundles_post_ra>
// kernel: tpu_custom_call.1
= control target key start
LH: loop header
LB: loop body
LE: loop exit
PB: predicated region body
PF: predicated region fallthrough
CT: control target
= control target key end

     0   :  { %v3359_v2 = vmov 1   ;;  %v3360_v3 = vmov 0   ;;  %s5246_s0 = inlined_call_operand.vmem [shape: f32[16,128], index: 0, kind: input, shape index: {}]   ;;  %s5247_s1 = inlined_call_operand.vmem [shape: f32[256,2], index: 1, kind: input, shape index: {}]   ;;  %s5248_s2 = inlined_call_operand.vmem [shape: f32[256,1], index: 2, kind: input, shape index: {}]   ;;  %s5249_s3 = inlined_call_operand.vmem [shape: bf16[256,256], index: 3, kind: input, shape index: {}]   ;;  %s5250_s4 = inlined_call_operand.vmem [shape: f32[256,1], index: 4, kind: input, shape index: {}]   ;;  %s5251_s5 = inlined_call_operand.vmem [shape: bf16[256,256], index: 5, kind: input, shape index: {}]   ;;  %s5252_s6 = inlined_call_operand.vmem [shape: f32[256,1], index: 6, kind: input, shape index: {}]   ;;  %s5253_s7 = inlined_call_operand.vmem [shape: bf16[256,256], index: 7, kind: input, shape index: {}]   ;;  %s5254_s8 = inlined_call_operand.vmem [shape: f32[256,1], index: 8, kind: input, shape index: {}]   ;;  %s5255_s9 = inlined_call_operand.vmem [shape: bf16[64,256], index: 9, kind: input, shape index: {}]   ;;  %s5256_s10 = inlined_call_operand.vmem [shape: f32[64,1], index: 10, kind: input, shape index: {}]   ;;  %s5257_s11 = inlined_call_operand.hbm [shape: f32[64,128], index: 11, kind: output, shape index: {}]  }
   0x1   :  { %v71_v0 = vld [vmem:[%s5247_s1 + $0xf0] sm:$0xff]  ;;  %3282 = vset.pattern.permute.xlu0 %v3359_v2  ;;  %3280 = vset.pattern.permute.xlu1 %v3359_v2 }
   0x2   :  { %v55_v1 = vld [vmem:[%s5247_s1 + $0x70] sm:$0xff]  ;;  %3281 = vset.pattern.permute.xlu2 %v3360_v3  ;;  %386 = vperm.xlu0 %3282, %v71_v0  }
   0x3   :  { %225 = vperm.xlu2 %3281, %v71_v0   ;;  %322 = vperm.xlu1 %3280, %v55_v1  }
   0x4   :  { %16 = vsyncpa [#allocation3], 0  ;;  %v54_v4 = vld [vmem:[%s5247_s1 + $0x68] sm:$0xff]  ;;  %v72_v5 = vld [vmem:[%s5247_s1 + $0xf8] sm:$0xff]  ;;  %s2727_s12 = sshll.u32 %s5257_s11, 4  ;;  %s3362_s13 = smov 128   ;;  %s2728_s12 = int_to_ptr.hbm [resolvable:$true] %s2727_s12 }
   0x5   :  { %v56_v6 = vld [vmem:[%s5247_s1 + $0x78] sm:$0xff]  ;;  %v51_v7 = vld [vmem:[%s5247_s1 + $0x50] sm:$0xff]  ;;  %v53_v8 = vld [vmem:[%s5247_s1 + $0x60] sm:$0xff] }
   0x6   :  { %v3451_v9 = vld [vmem:[%s5247_s1 + $0x48] sm:$0xff]  ;;  %v3459_v10 = vld [vmem:[%s5247_s1 + $0xc0] sm:$0xff]  ;;  %v471_v11 = vld [vmem:[%s5248_s2 + $0x70] sm:$0xff] }
   0x7   :  { %v472_v12 = vld [vmem:[%s5248_s2 + $0x78] sm:$0xff]  ;;  %v70_v13 = vld [vmem:[%s5247_s1 + $0xe8] sm:$0xff]  ;;  %v69_v14 = vld [vmem:[%s5247_s1 + $0xe0] sm:$0xff] }
   0x8   :  { %v487_v15 = vld [vmem:[%s5248_s2 + $0xf0] sm:$0xff]  ;;  %v52_v16 = vld [vmem:[%s5247_s1 + $0x58] sm:$0xff]  ;;  %v469_v18 = vld [vmem:[%s5248_s2 + $0x60] sm:$0xff] }
   0x9   :  { %v488_v17 = vld [vmem:[%s5248_s2 + $0xf8] sm:$0xff]  ;;  %v67_v20 = vld [vmem:[%s5247_s1 + $0xd0] sm:$0xff]  ;;  %v470_v21 = vld [vmem:[%s5248_s2 + $0x68] sm:$0xff] }
   0xa   :  { %318 = vperm.xlu0 %3282, %v54_v4   ;;  %v68_v19 = vld [vmem:[%s5247_s1 + $0xd8] sm:$0xff]  ;;  %v49_v22 = vld [vmem:[%s5247_s1 + $0x40] sm:$0xff]  ;;  %v486_v25 = vld [vmem:[%s5248_s2 + $0xe8] sm:$0xff] }
   0xb   :  { %230 = vperm.xlu2 %3281, %v72_v5   ;;  %326 = vperm.xlu1 %3280, %v56_v6   ;;  %v484_v23 = vld [vmem:[%s5248_s2 + $0xd8] sm:$0xff]  ;;  %v485_v26 = vld [vmem:[%s5248_s2 + $0xe0] sm:$0xff]  ;;  %v467_v31 = vld [vmem:[%s5248_s2 + $0x50] sm:$0xff] }
   0xc   :  { %v465_v27 = vld [vmem:[%s5248_s2 + $0x40] sm:$0xff]  ;;  %v3529_v29 = vld [vmem:[%s5247_s1 + $0xb8] sm:$0xff]  ;;  %v66_v37 = vld [vmem:[%s5247_s1 + $0xc8] sm:$0xff] }
   0xd   :  { %v468_v32 = vld [vmem:[%s5248_s2 + $0x58] sm:$0xff]  ;;  %v481_v33 = vld [vmem:[%s5248_s2 + $0xc0] sm:$0xff]  ;;  %v3556_v38 = vld [vmem:[%s5247_s1 + $0x28] sm:$0xff] }
   0xe   :  { %v483_v42 = vld [vmem:[%s5248_s2 + $0xd0] sm:$0xff]  ;;  %v48_v47 = vld [vmem:[%s5247_s1 + $0x38] sm:$0xff]  ;;  %v3584_v49 = vld [vmem:[%s5247_s1 + $0xa8] sm:$0xff] }
   0xf   :  { %v463_v43 = vld [vmem:[%s5248_s2 + $0x30] sm:$0xff]  ;;  %v3604_v57 = vld [vmem:[%s5247_s1 + $0x18] sm:$0xff]  ;;  %v466_v59 = vld [vmem:[%s5248_s2 + $0x48] sm:$0xff] }
  0x10   :  { %v47_v48 = vld [vmem:[%s5247_s1 + $0x30] sm:$0xff]  ;;  %v3620_v62 = vld [vmem:[%s5246_s0] sm:$0xff]  ;;  %v3625_v63 = vld [vmem:[%s5246_s0 + $0x8] sm:$0xff] }
  0x11   :  { %v479_v53 = vld [vmem:[%s5248_s2 + $0xb0] sm:$0xff] }
  0x12   :  { %306 = vperm.xlu0 %3282, %v51_v7   ;;  %v63_v58 = vld [vmem:[%s5247_s1 + $0xb0] sm:$0xff] }
  0x13   :  { %390 = vperm.xlu1 %3280, %v72_v5   ;;  %135 = vperm.xlu2 %3281, %v53_v8   ;;  %v461_v5 = vld [vmem:[%s5248_s2 + $0x20] sm:$0xff] }
  0x1a   :  { %302 = vperm.xlu0 %3282, %v3451_v9  }
  0x1b   :  { %3283 = vset.pattern.permute.xlu1 %v3360_v3  ;;  %3284 = vset.pattern.permute.xlu2 %v3359_v2 }
  0x1c   :  { %140 = vperm.xlu1 %3283, %v54_v4   ;;  %314 = vperm.xlu2 %3284, %v53_v8  }
  0x22   :  { %362 = vperm.xlu0 %3282, %v3459_v10  }
  0x24   :  { %561 = vperm.xlu1 %3283, %v471_v11   ;;  %3285 = vset.pattern.permute.xlu2 %v3360_v3 }
  0x25   :  { %566 = vperm.xlu2 %3285, %v472_v12  }
  0x2a   :  { %3298 = vset.pattern.permute.xlu0 %v3360_v3 }
  0x2b   :  { %145 = vperm.xlu0 %3298, %v55_v1  }
  0x2c   :  { %220 = vperm.xlu1 %3283, %v70_v13  }
  0x2d   :  { %3286 = vset.pattern.permute.xlu2 %v3359_v2 }
  0x2e   :  { %378 = vperm.xlu2 %3286, %v69_v14  }
  0x33   :  { %150 = vperm.xlu0 %3298, %v56_v6  }
  0x34   :  { %3287 = vset.pattern.permute.xlu1 %v3359_v2 }
  0x35   :  { %382 = vperm.xlu1 %3287, %v70_v13  }
  0x36   :  { %3288 = vset.pattern.permute.xlu2 %v3360_v3 }
  0x37   :  { %641 = vperm.xlu2 %3288, %v487_v15  }
  0x3b   :  { %215 = vperm.xlu0 %3298, %v69_v14   ;;  %v3646_v14 = vld [vmem:[%s5247_s1 + $0x98] sm:$0xff] }
  0x3d   :  { %3289 = vset.pattern.permute.xlu1 %v3360_v3 }
  0x3e   :  { %125 = vperm.xlu1 %3289, %v51_v7  }
  0x3f   :  { %130 = vperm.xlu2 %3288, %v52_v16  }
  0x43   :  { %646 = vperm.xlu0 %3298, %v488_v17  }
  0x46   :  { %3290 = vset.pattern.permute.xlu1 %v3359_v2 }
  0x47   :  { %551 = vperm.xlu2 %3288, %v469_v18   ;;  %310 = vperm.xlu1 %3290, %v52_v16   ;;  %v45_v16 = vld [vmem:[%s5247_s1 + $0x20] sm:$0xff] }
  0x4b   :  { %210 = vperm.xlu0 %3298, %v68_v19  }
  0x4f   :  { %205 = vperm.xlu2 %3288, %v67_v20   ;;  %3291 = vset.pattern.permute.xlu1 %v3360_v3 }
  0x50   :  { %556 = vperm.xlu1 %3291, %v470_v21  }
  0x53   :  { %115 = vperm.xlu0 %3298, %v49_v22  }
  0x57   :  { %3293 = vset.pattern.permute.xlu2 %v3359_v2 }
  0x58   :  { %374 = vperm.xlu2 %3293, %v68_v19   ;;  %3292 = vset.pattern.permute.xlu1 %v3359_v2 }
  0x59   :  { %370 = vperm.xlu1 %3292, %v67_v20  }
  0x5b   :  { %626 = vperm.xlu0 %3298, %v484_v23  }
  0x5d   :  { %v3511_v24 = vpop.permute.xlu2 %225 }
  0x5e   :  { %v263_v20 = vmul.f32 %v3511_v24, %v3620_v62 }
  0x60   :  { %3295 = vset.pattern.permute.xlu2 %v3360_v3 }
  0x61   :  { %636 = vperm.xlu2 %3295, %v486_v25   ;;  %3294 = vset.pattern.permute.xlu1 %v3360_v3 }
  0x62   :  { %631 = vperm.xlu1 %3294, %v485_v26  }
  0x63   :  { %531 = vperm.xlu0 %3298, %v465_v27  }
  0x65   :  { %v3524_v28 = vpop.permute.xlu2 %230 }
  0x66   :  { %v264_v24 = vmul.f32 %v3524_v28, %v3620_v62 }
  0x69   :  { %3296 = vset.pattern.permute.xlu2 %v3359_v2 }
  0x6a   :  { %120 = vperm.xlu1 %3294, %v3451_v9   ;;  %298 = vperm.xlu2 %3296, %v49_v22   ;;  %v482_v22 = vld [vmem:[%s5248_s2 + $0xc8] sm:$0xff] }
  0x6b   :  { %190 = vperm.xlu0 %3298, %v3529_v29  }
  0x6d   :  { %v3534_v30 = vpop.permute.xlu2 %135 }
  0x72   :  { %541 = vperm.xlu1 %3294, %v467_v31   ;;  %3297 = vset.pattern.permute.xlu2 %v3360_v3  ;;  %v477_v31 = vld [vmem:[%s5248_s2 + $0xa0] sm:$0xff] }
  0x73   :  { %546 = vperm.xlu2 %3297, %v468_v32   ;;  %611 = vperm.xlu0 %3298, %v481_v33  }
  0x74   :  { %v3546_v34 = vpop.permute.xlu0 %386 }
  0x75   :  { %v323_v35 = vpop.permute.xlu1 %322  ;;  %v423_v21 = vmul.f32 %v3546_v34, %v3625_v63 }
  0x76   :  { %v3548_v36 = vpop.permute.xlu2 %314  ;;  %v407_v4 = vmul.f32 %v323_v35, %v3625_v63 }
  0x77   :  { %v455_v27 = vadd.f32 %v423_v21, %v263_v20 }
  0x7a   :  { %195 = vperm.xlu1 %3294, %v3459_v10  }
  0x7b   :  { %200 = vperm.xlu2 %3297, %v66_v37   ;;  %100 = vperm.xlu0 %3298, %v3556_v38  }
  0x7c   :  { %v3560_v39 = vpop.permute.xlu0 %318 }
  0x7d   :  { %v327_v40 = vpop.permute.xlu1 %326 }
  0x7e   :  { %v408_v8 = vmul.f32 %v327_v40, %v3625_v63 }
  0x7f   :  { %v567_v41 = vpop.permute.xlu2 %566 }
  0x82   :  { %3299 = vset.pattern.permute.xlu1 %v3359_v2 }
  0x83   :  { %366 = vperm.xlu1 %3299, %v66_v37   ;;  %621 = vperm.xlu2 %3297, %v483_v42  }
  0x84   :  { %521 = vperm.xlu0 %3298, %v463_v43   ;;  %v3569_v44 = vpop.permute.xlu0 %306  ;;  %v245_v43 = vmul.f32 %v3534_v30, %v3620_v62  ;;  %v464_v30 = vld [vmem:[%s5248_s2 + $0x38] sm:$0xff] }
  0x85   :  { %v3571_v45 = vpop.permute.xlu1 %390 }
  0x86   :  { %v424_v25 = vmul.f32 %v3571_v45, %v3625_v63  ;;  %v405_v45 = vmul.f32 %v3548_v36, %v3625_v63 }
  0x88   :  { %v3573_v46 = vpop.permute.xlu2 %378  ;;  %v456_v33 = vadd.f32 %v424_v25, %v264_v24 }
  0x8b   :  { %3300 = vset.pattern.permute.xlu1 %v3360_v3  ;;  %110 = vperm.xlu2 %3297, %v48_v47  }
  0x8c   :  { %105 = vperm.xlu1 %3300, %v47_v48   ;;  %180 = vperm.xlu0 %3298, %v3584_v49   ;;  %v3588_v50 = vpop.permute.xlu0 %302 }
  0x8e   :  { %v3590_v51 = vpop.permute.xlu1 %140 }
  0x91   :  { %v642_v52 = vpop.permute.xlu2 %641 }
  0x92   :  { %v679_v32 = vadd.f32 %v642_v52, %v455_v27  ;;  %v61_v52 = vld [vmem:[%s5247_s1 + $0xa0] sm:$0xff] }
  0x93   :  { %3302 = vset.pattern.permute.xlu2 %v3359_v2 }
  0x94   :  { %294 = vperm.xlu2 %3302, %v48_v47   ;;  %3301 = vset.pattern.permute.xlu1 %v3359_v2  ;;  %v3597_v54 = vpop.permute.xlu0 %362  ;;  %v711_v37 = vmax.f32 %v679_v32, 0.0 }
  0x95   :  { %601 = vperm.xlu0 %3298, %v479_v53   ;;  %290 = vperm.xlu1 %3301, %v47_v48   ;;  %v246_v48 = vmul.f32 %v3590_v51, %v3620_v62  ;;  %v437_v53 = vadd.f32 %v405_v45, %v245_v43  ;;  %v403_v43 = vmul.f32 %v3569_v44, %v3625_v63  ;;  %v59_v44 = vld [vmem:[%s5247_s1 + $0x90] sm:$0xff] }
  0x96   :  { %v562_v55 = vpop.permute.xlu1 %561 }
  0x99   :  { %v3599_v56 = vpop.permute.xlu2 %130 }
  0x9a   :  { %v244_v45 = vmul.f32 %v3599_v56, %v3620_v62  ;;  %v462_v56 = vld [vmem:[%s5248_s2 + $0x28] sm:$0xff] }
  0x9c   :  { %3304 = vset.pattern.permute.xlu2 %v3360_v3 }
  0x9d   :  { %90 = vperm.xlu0 %3298, %v3604_v57   ;;  %185 = vperm.xlu2 %3304, %v63_v58   ;;  %v146_v60 = vpop.permute.xlu0 %145 }
  0x9e   :  { %3303 = vset.pattern.permute.xlu1 %v3360_v3  ;;  %v3615_v61 = vpop.permute.xlu1 %220  ;;  %v247_v0 = vmul.f32 %v146_v60, %v3620_v62 }
  0x9f   :  { %536 = vperm.xlu1 %3303, %v466_v59  }
  0xa0   :  { %v439_v6 = vadd.f32 %v407_v4, %v247_v0 }
  0xa1   :  { %v3628_v1 = vpop.permute.xlu2 %551 }
  0xa2   :  { %v663_v12 = vadd.f32 %v562_v55, %v439_v6  ;;  %v661_v36 = vadd.f32 %v3628_v1, %v437_v53  ;;  %v459_v55 = vld [vmem:[%s5248_s2 + $0x10] sm:$0xff]  ;;  %v3712_v1 = vld [vmem:[%s5247_s1 + $0x88] sm:$0xff] }
  0xa4   :  { %v695_v17 = vmax.f32 %v663_v12, 0.0  ;;  %v693_v60 = vmax.f32 %v661_v36, 0.0  ;;  %v43_v12 = vld [vmem:[%s5247_s1 + $0x10] sm:$0xff] }
  0xa5   :  { %511 = vperm.xlu0 %3298, %v461_v5   ;;  %3306 = vset.pattern.permute.xlu2 %v3359_v2  ;;  %v151_v7 = vpop.permute.xlu0 %150 }
  0xa6   :  { %v248_v9 = vmul.f32 %v151_v7, %v3620_v62  ;;  %358 = vperm.xlu2 %3306, %v3529_v29  }
  0xa7   :  { %3305 = vset.pattern.permute.xlu1 %v3359_v2  ;;  %v3639_v10 = vpop.permute.xlu1 %382 }
  0xa8   :  { %v440_v11 = vadd.f32 %v408_v8, %v248_v9  ;;  %354 = vperm.xlu1 %3305, %v63_v58   ;;  %v422_v7 = vmul.f32 %v3639_v10, %v3625_v63  ;;  %v262_v9 = vmul.f32 %v3615_v61, %v3620_v62  ;;  %v480_v10 = vld [vmem:[%s5248_s2 + $0xb8] sm:$0xff]  ;;  %v475_v61 = vld [vmem:[%s5248_s2 + $0x90] sm:$0xff] }
  0xa9   :  { %v3641_v13 = vpop.permute.xlu2 %205 }
  0xaa   :  { %v664_v15 = vadd.f32 %v567_v41, %v440_v11  ;;  %v3682_v41 = vld [vmem:[%s5247_s1 + $0x8] sm:$0xff] }
  0xac   :  { %v696_v18 = vmax.f32 %v664_v15, 0.0  ;;  %v421_v15 = vmul.f32 %v3573_v46, %v3625_v63 }
  0xad   :  { %170 = vperm.xlu0 %3298, %v3646_v14   ;;  %v3652_v19 = vpop.permute.xlu0 %215 }
  0xae   :  { %3308 = vset.pattern.permute.xlu2 %v3360_v3  ;;  %v752_v23 = vpack.c.bf16 %v696_v18, %v695_v17 }
  0xaf   :  { %95 = vperm.xlu2 %3308, %v45_v16  }
  0xb0   :  { %3307 = vset.pattern.permute.xlu1 %v3360_v3  ;;  %v3665_v26 = vpop.permute.xlu1 %125  ;;  %1113 = vmatpush.bf16.msra.mxu0 %v752_v23 }
  0xb1   :  { %616 = vperm.xlu1 %3307, %v482_v22   ;;  %3259 = vmatpush.bf16.msra.mxu2 %v752_v23 }
  0xb2   :  { %v3669_v29 = vpop.permute.xlu2 %374 }
  0xb5   :  { %591 = vperm.xlu0 %3298, %v477_v31   ;;  %v647_v34 = vpop.permute.xlu0 %646 }
  0xb6   :  { %v680_v35 = vadd.f32 %v647_v34, %v456_v33  ;;  %v458_v33 = vld [vmem:[%s5248_s2 + $0x8] sm:$0xff] }
  0xb7   :  { %3310 = vset.pattern.permute.xlu2 %v3359_v2 }
  0xb8   :  { %v712_v40 = vmax.f32 %v680_v35, 0.0  ;;  %286 = vperm.xlu2 %3310, %v3556_v38   ;;  %v406_v38 = vmul.f32 %v3560_v39, %v3625_v63 }
  0xb9   :  { %3309 = vset.pattern.permute.xlu1 %v3359_v2  ;;  %v3677_v28 = vpop.permute.xlu1 %310 }
  0xba   :  { %282 = vperm.xlu1 %3309, %v45_v16   ;;  %v760_v42 = vpack.c.bf16 %v712_v40, %v711_v37  ;;  %v438_v39 = vadd.f32 %v406_v38, %v246_v48  ;;  %v454_v16 = vadd.f32 %v422_v7, %v262_v9  ;;  %v404_v40 = vmul.f32 %v3677_v28, %v3625_v63  ;;  %v775_v28 = vld [vmem:[%s5250_s4 + $0x70] sm:$0xff]  ;;  %v41_v9 = vld [vmem:[%s5247_s1] sm:$0xff] }
  0xbb   :  { %v637_v47 = vpop.permute.xlu2 %636 }
  0xbc   :  { %1202 = vmatpush.bf16.msra.mxu1 %v760_v42  ;;  %3267 = vmatpush.bf16.msra.mxu3 %v760_v42  ;;  %v678_v17 = vadd.f32 %v637_v47, %v454_v16  ;;  %v243_v47 = vmul.f32 %v3665_v26, %v3620_v62  ;;  %v436_v48 = vadd.f32 %v404_v40, %v244_v45  ;;  %v457_v40 = vld [vmem:[%s5248_s2] sm:$0xff] }
  0xbd   :  { %80 = vperm.xlu0 %3298, %v3682_v41   ;;  %v211_v0 = vpop.permute.xlu0 %210  ;;  %v417_v45 = vmul.f32 %v3597_v54, %v3625_v63  ;;  %v473_v54 = vld [vmem:[%s5248_s2 + $0x80] sm:$0xff] }
  0xbe   :  { %v260_v20 = vmul.f32 %v211_v0, %v3620_v62  ;;  %v710_v23 = vmax.f32 %v678_v17, 0.0 }
  0xc0   :  { %3312 = vset.pattern.permute.xlu2 %v3360_v3 }
  0xc1   :  { %175 = vperm.xlu2 %3312, %v61_v52  }
  0xc2   :  { %3311 = vset.pattern.permute.xlu1 %v3360_v3  ;;  %v557_v51 = vpop.permute.xlu1 %556 }
  0xc3   :  { %v662_v58 = vadd.f32 %v557_v51, %v438_v39  ;;  %526 = vperm.xlu1 %3311, %v464_v30   ;;  %v435_v30 = vadd.f32 %v403_v43, %v243_v47 }
  0xc4   :  { %v3705_v59 = vpop.permute.xlu2 %298 }
  0xc5   :  { %v694_v4 = vmax.f32 %v662_v58, 0.0  ;;  %501 = vperm.xlu0 %3298, %v459_v55   ;;  %v3722_v11 = vpop.permute.xlu0 %115 }
  0xc7   :  { %v751_v5 = vpack.c.bf16 %v694_v4, %v693_v60  ;;  %v792_v60 = vld [vmem:[%s5250_s4 + $0xf8] sm:$0xff] }
  0xc9   :  { %3314 = vset.pattern.permute.xlu2 %v3359_v2  ;;  %1114 = vmatpush.bf16.msra.mxu0 %v751_v5 }
  0xca   :  { %3260 = vmatpush.bf16.msra.mxu2 %v751_v5  ;;  %350 = vperm.xlu2 %3314, %v3584_v49   ;;  %v261_v49 = vmul.f32 %v3652_v19, %v3620_v62  ;;  %v420_v19 = vmul.f32 %v3669_v29, %v3625_v63  ;;  %v259_v29 = vmul.f32 %v3641_v13, %v3620_v62 }
  0xcb   :  { %3313 = vset.pattern.permute.xlu1 %v3359_v2  ;;  %v371_v6 = vpop.permute.xlu1 %370 }
  0xcc   :  { %346 = vperm.xlu1 %3313, %v61_v52   ;;  %v453_v18 = vadd.f32 %v421_v15, %v261_v49  ;;  %v419_v24 = vmul.f32 %v371_v6, %v3625_v63  ;;  %v452_v27 = vadd.f32 %v420_v19, %v260_v20  ;;  %v789_v6 = vld [vmem:[%s5250_s4 + $0xe0] sm:$0xff]  ;;  %v772_v49 = vld [vmem:[%s5250_s4 + $0x58] sm:$0xff]  ;;  %v401_v20 = vmul.f32 %v3705_v59, %v3625_v63 }
  0xcd   :  { %160 = vperm.xlu0 %3298, %v3712_v1   ;;  %v547_v8 = vpop.permute.xlu2 %546  ;;  %v627_v31 = vpop.permute.xlu0 %626  ;;  %v57_v19 = vld [vmem:[%s5247_s1 + $0x80] sm:$0xff] }
  0xce   :  { %v676_v34 = vadd.f32 %v627_v31, %v452_v27  ;;  %v451_v37 = vadd.f32 %v419_v24, %v259_v29  ;;  %v660_v53 = vadd.f32 %v547_v8, %v436_v48 }
  0xd0   :  { %v692_v39 = vmax.f32 %v660_v53, 0.0 }
  0xd2   :  { %3316 = vset.pattern.permute.xlu2 %v3360_v3 }
  0xd3   :  { %85 = vperm.xlu2 %3316, %v43_v12  }
  0xd4   :  { %3315 = vset.pattern.permute.xlu1 %v3360_v3  ;;  %v632_v46 = vpop.permute.xlu1 %631 }
  0xd5   :  { %v677_v21 = vadd.f32 %v632_v46, %v453_v18  ;;  %606 = vperm.xlu1 %3315, %v480_v10   ;;  %581 = vperm.xlu0 %3298, %v475_v61   ;;  %v3740_v22 = vpop.permute.xlu2 %200  ;;  %v532_v55 = vpop.permute.xlu0 %531  ;;  %v769_v10 = vld [vmem:[%s5250_s4 + $0x40] sm:$0xff]  ;;  %v460_v46 = vld [vmem:[%s5248_s2 + $0x18] sm:$0xff] }
  0xd7   :  { %v709_v25 = vmax.f32 %v677_v21, 0.0  ;;  %v786_v21 = vld [vmem:[%s5250_s4 + $0xc8] sm:$0xff] }
  0xd9   :  { %v759_v32 = vpack.c.bf16 %v710_v23, %v709_v25 }
  0xdb   :  { %3318 = vset.pattern.permute.xlu2 %v3359_v2  ;;  %1203 = vmatpush.bf16.msra.mxu1 %v759_v32 }
  0xdc   :  { %3268 = vmatpush.bf16.msra.mxu3 %v759_v32  ;;  %v3749_v35 = vpop.permute.xlu1 %120  ;;  %278 = vperm.xlu2 %3318, %v3604_v57   ;;  %v708_v57 = vmax.f32 %v676_v34, 0.0 }
  0xdd   :  { %3317 = vset.pattern.permute.xlu1 %v3359_v2  ;;  %496 = vperm.xlu0 %3298, %v458_v33   ;;  %v622_v13 = vpop.permute.xlu2 %621  ;;  %v3782_v5 = vpop.permute.xlu0 %190  ;;  %v242_v59 = vmul.f32 %v3749_v35, %v3620_v62  ;;  %v783_v33 = vld [vmem:[%s5250_s4 + $0xb0] sm:$0xff] }
  0xde   :  { %v675_v42 = vadd.f32 %v622_v13, %v451_v37  ;;  %274 = vperm.xlu1 %3317, %v43_v12  }
  0xe0   :  { %v707_v38 = vmax.f32 %v675_v42, 0.0 }
  0xe2   :  { %v758_v52 = vpack.c.bf16 %v708_v57, %v707_v38  ;;  %v258_v38 = vmul.f32 %v3740_v22, %v3620_v62 }
  0xe4   :  { %v542_v36 = vpop.permute.xlu1 %541  ;;  %3320 = vset.pattern.permute.xlu2 %v3360_v3  ;;  %1204 = vmatpush.bf16.msra.mxu1 %v758_v52 }
  0xe5   :  { %v659_v26 = vadd.f32 %v542_v36, %v435_v30  ;;  %865 = vperm.xlu0 %3298, %v775_v28   ;;  %3269 = vmatpush.bf16.msra.mxu3 %v758_v52  ;;  %v3775_v0 = vpop.permute.xlu2 %110  ;;  %v3802_v12 = vpop.permute.xlu0 %611  ;;  %v474_v28 = vld [vmem:[%s5248_s2 + $0x88] sm:$0xff] }
  0xe6   :  { %3319 = vset.pattern.permute.xlu1 %v3360_v3  ;;  %165 = vperm.xlu2 %3320, %v59_v44  }
  0xe7   :  { %v691_v51 = vmax.f32 %v659_v26, 0.0  ;;  %516 = vperm.xlu1 %3319, %v462_v56  }
  0xe9   :  { %v750_v58 = vpack.c.bf16 %v692_v39, %v691_v51  ;;  %v791_v39 = vld [vmem:[%s5250_s4 + $0xf0] sm:$0xff]  ;;  %v780_v51 = vld [vmem:[%s5250_s4 + $0x98] sm:$0xff] }
  0xeb   :  { %1115 = vmatpush.bf16.msra.mxu0 %v750_v58  ;;  %3261 = vmatpush.bf16.msra.mxu2 %v750_v58 }
  0xec   :  { %v3777_v4 = vpop.permute.xlu1 %195 }
  0xed   :  { %950 = vperm.xlu0 %3298, %v792_v60   ;;  %v3814_v61 = vpop.permute.xlu0 %100  ;;  %v257_v13 = vmul.f32 %v3777_v4, %v3620_v62 }
  0xee   :  { %3322 = vset.pattern.permute.xlu2 %v3359_v2  ;;  %v3787_v7 = vpop.permute.xlu2 %294 }
  0xef   :  { %3321 = vset.pattern.permute.xlu1 %v3359_v2  ;;  %342 = vperm.xlu2 %3322, %v3646_v14   ;;  %v478_v14 = vld [vmem:[%s5248_s2 + $0xa8] sm:$0xff]  ;;  %v449_v47 = vadd.f32 %v417_v45, %v257_v13  ;;  %v787_v13 = vld [vmem:[%s5250_s4 + $0xd0] sm:$0xff] }
  0xf0   :  { %338 = vperm.xlu1 %3321, %v59_v44  }
  0xf1   :  { %v673_v53 = vadd.f32 %v3802_v12, %v449_v47  ;;  %v240_v12 = vmul.f32 %v3775_v0, %v3620_v62  ;;  %v785_v47 = vld [vmem:[%s5250_s4 + $0xc0] sm:$0xff] }
  0xf3   :  { %v705_v56 = vmax.f32 %v673_v53, 0.0 }
  0xf5   :  { %935 = vperm.xlu0 %3298, %v789_v6   ;;  %v3789_v8 = vpop.permute.xlu1 %366 }
  0xf6   :  { %v3841_v31 = vpop.permute.xlu0 %521  ;;  %v418_v57 = vmul.f32 %v3789_v8, %v3625_v63 }
  0xf7   :  { %3324 = vset.pattern.permute.xlu2 %v3360_v3  ;;  %v3804_v15 = vpop.permute.xlu2 %185 }
  0xf8   :  { %3323 = vset.pattern.permute.xlu1 %v3360_v3  ;;  %75 = vperm.xlu2 %3324, %v41_v9   ;;  %v450_v52 = vadd.f32 %v418_v57, %v258_v38  ;;  %v1400_v38 = vld [vmem:[%s5252_s6 + $0xe8] sm:$0xff] }
  0xf9   :  { %596 = vperm.xlu1 %3323, %v478_v14  }
  0xfd   :  { %850 = vperm.xlu0 %3298, %v772_v49   ;;  %v774_v49 = vld [vmem:[%s5250_s4 + $0x68] sm:$0xff] }
  0xfe   :  { %v3806_v16 = vpop.permute.xlu1 %105  ;;  %v3864_v43 = vpop.permute.xlu0 %180 }
  0xff   :  { %v239_v6 = vmul.f32 %v3806_v16, %v3620_v62  ;;  %v773_v16 = vld [vmem:[%s5250_s4 + $0x60] sm:$0xff] }
 0x100   :  { %3326 = vset.pattern.permute.xlu2 %v3359_v2  ;;  %v3816_v17 = vpop.permute.xlu2 %358 }
 0x101   :  { %3325 = vset.pattern.permute.xlu1 %v3359_v2  ;;  %270 = vperm.xlu2 %3326, %v3682_v41   ;;  %v241_v41 = vmul.f32 %v3722_v11, %v3620_v62  ;;  %v402_v11 = vmul.f32 %v3588_v50, %v3625_v63 }
 0x102   :  { %266 = vperm.xlu1 %3325, %v41_v9   ;;  %v400_v9 = vmul.f32 %v3787_v7, %v3625_v63 }
 0x103   :  { %v433_v23 = vadd.f32 %v401_v20, %v241_v41  ;;  %v434_v27 = vadd.f32 %v402_v11, %v242_v59  ;;  %v1386_v11 = vld [vmem:[%s5252_s6 + $0x78] sm:$0xff] }
 0x104   :  { %v432_v7 = vadd.f32 %v400_v9, %v240_v12  ;;  %v765_v9 = vld [vmem:[%s5250_s4 + $0x20] sm:$0xff] }
 0x105   :  { %835 = vperm.xlu0 %3298, %v769_v10   ;;  %v657_v24 = vadd.f32 %v532_v55, %v433_v23  ;;  %v776_v55 = vld [vmem:[%s5250_s4 + $0x78] sm:$0xff]  ;;  %v777_v10 = vld [vmem:[%s5250_s4 + $0x80] sm:$0xff]  ;;  %v771_v23 = vld [vmem:[%s5250_s4 + $0x50] sm:$0xff] }
 0x107   :  { %v3818_v18 = vpop.permute.xlu1 %290  ;;  %v689_v34 = vmax.f32 %v657_v24, 0.0  ;;  %v602_v22 = vpop.permute.xlu0 %601  ;;  %v790_v24 = vld [vmem:[%s5250_s4 + $0xe8] sm:$0xff] }
 0x108   :  { %v399_v60 = vmul.f32 %v3818_v18, %v3625_v63 }
 0x109   :  { %3328 = vset.pattern.permute.xlu2 %v3360_v3  ;;  %v3839_v25 = vpop.permute.xlu2 %95 }
 0x10a   :  { %3327 = vset.pattern.permute.xlu1 %v3360_v3  ;;  %155 = vperm.xlu2 %3328, %v57_v19   ;;  %v431_v14 = vadd.f32 %v399_v60, %v239_v6 }
 0x10b   :  { %506 = vperm.xlu1 %3327, %v460_v46  }
 0x10d   :  { %920 = vperm.xlu0 %3298, %v786_v21  }
 0x10f   :  { %v3903_v8 = vpop.permute.xlu0 %90 }
 0x111   :  { %v537_v32 = vpop.permute.xlu1 %536 }
 0x112   :  { %v658_v29 = vadd.f32 %v537_v32, %v434_v27  ;;  %3330 = vset.pattern.permute.xlu2 %v3359_v2  ;;  %v3849_v37 = vpop.permute.xlu2 %286 }
 0x113   :  { %3329 = vset.pattern.permute.xlu1 %v3359_v2  ;;  %334 = vperm.xlu2 %3330, %v3712_v1   ;;  %v766_v2 = vld [vmem:[%s5250_s4 + $0x28] sm:$0xff]  ;;  %v476_v1 = vld [vmem:[%s5248_s2 + $0x98] sm:$0xff]  ;;  %s3363_s2 = smov 8  }
 0x114   :  { %v690_v50 = vmax.f32 %v658_v29, 0.0  ;;  %330 = vperm.xlu1 %3329, %v57_v19   ;;  %v655_v19 = vadd.f32 %v3841_v31, %v431_v14  ;;  %v255_v29 = vmul.f32 %v3804_v15, %v3620_v62  ;;  %v256_v15 = vmul.f32 %v3782_v5, %v3620_v62  ;;  %v770_v5 = vld [vmem:[%s5250_s4 + $0x48] sm:$0xff] }
 0x115   :  { %905 = vperm.xlu0 %3298, %v783_v33   ;;  %v788_v33 = vld [vmem:[%s5250_s4 + $0xd8] sm:$0xff] }
 0x116   :  { %v749_v35 = vpack.c.bf16 %v690_v50, %v689_v34  ;;  %v687_v0 = vmax.f32 %v655_v19, 0.0  ;;  %v416_v34 = vmul.f32 %v3816_v17, %v3625_v63  ;;  %v782_v19 = vld [vmem:[%s5250_s4 + $0xa8] sm:$0xff] }
 0x117   :  { %v512_v21 = vpop.permute.xlu0 %511 }
 0x118   :  { %1116 = vmatpush.bf16.msra.mxu0 %v749_v35  ;;  %3262 = vmatpush.bf16.msra.mxu2 %v749_v35  ;;  %v1383_v35 = vld [vmem:[%s5252_s6 + $0x60] sm:$0xff]  ;;  %v448_v17 = vadd.f32 %v416_v34, %v256_v15  ;;  %v764_v34 = vld [vmem:[%s5250_s4 + $0x18] sm:$0xff]  ;;  %v762_v15 = vld [vmem:[%s5250_s4 + $0x8] sm:$0xff] }
 0x11a   :  { %v3856_v42 = vpop.permute.xlu1 %354 }
 0x11b   :  { %3332 = vset.pattern.permute.xlu2 %v3360_v3  ;;  %v3874_v48 = vpop.permute.xlu2 %175  ;;  %v415_v31 = vmul.f32 %v3856_v42, %v3625_v63 }
 0x11c   :  { %3331 = vset.pattern.permute.xlu1 %v3360_v3  ;;  %491 = vperm.xlu2 %3332, %v457_v40   ;;  %v763_v3 = vld [vmem:[%s5250_s4 + $0x10] sm:$0xff] }
 0x11d   :  { %820 = vperm.xlu0 %3298, %v766_v2   ;;  %586 = vperm.xlu1 %3331, %v476_v1   ;;  %v447_v50 = vadd.f32 %v415_v31, %v255_v29  ;;  %v779_v31 = vld [vmem:[%s5250_s4 + $0x90] sm:$0xff] }
 0x11f   :  { %v3944_v40 = vpop.permute.xlu0 %170  ;;  %v671_v2 = vadd.f32 %v602_v22, %v447_v50  ;;  %v237_v22 = vmul.f32 %v3839_v25, %v3620_v62 }
 0x123   :  { %v617_v30 = vpop.permute.xlu1 %616 }
 0x124   :  { %v674_v44 = vadd.f32 %v617_v30, %v450_v52  ;;  %576 = vperm.xlu2 %3332, %v474_v28   ;;  %v3895_v58 = vpop.permute.xlu2 %350  ;;  %v703_v28 = vmax.f32 %v671_v2, 0.0 }
 0x125   :  { %805 = vperm.xlu0 %3298, %v763_v3   ;;  %571 = vperm.xlu1 %3331, %v473_v54  }
 0x126   :  { %v706_v36 = vmax.f32 %v674_v44, 0.0  ;;  %v768_v44 = vld [vmem:[%s5250_s4 + $0x38] sm:$0xff] }
 0x127   :  { %v592_v3 = vpop.permute.xlu0 %591 }
 0x128   :  { %v757_v26 = vpack.c.bf16 %v706_v36, %v705_v56  ;;  %v1397_v36 = vld [vmem:[%s5252_s6 + $0xd0] sm:$0xff] }
 0x129   :  { %v767_v56 = vld [vmem:[%s5250_s4 + $0x30] sm:$0xff] }
 0x12a   :  { %1205 = vmatpush.bf16.msra.mxu1 %v757_v26  ;;  %3270 = vmatpush.bf16.msra.mxu3 %v757_v26  ;;  %v398_v26 = vmul.f32 %v3849_v37, %v3625_v63  ;;  %v1380_v37 = vld [vmem:[%s5252_s6 + $0x48] sm:$0xff] }
 0x12c   :  { %v3899_v4 = vpop.permute.xlu1 %282  ;;  %945 = vperm.xlu2 %3332, %v791_v39  }
 0x12d   :  { %890 = vperm.xlu0 %3298, %v780_v51   ;;  %870 = vperm.xlu1 %3331, %v776_v55   ;;  %v3918_v18 = vpop.permute.xlu2 %85  ;;  %v397_v53 = vmul.f32 %v3899_v4, %v3625_v63  ;;  %v238_v51 = vmul.f32 %v3814_v61, %v3620_v62  ;;  %v784_v61 = vld [vmem:[%s5250_s4 + $0xb8] sm:$0xff] }
 0x12f   :  { %v429_v39 = vadd.f32 %v397_v53, %v237_v22  ;;  %v3983_v55 = vpop.permute.xlu0 %80  ;;  %v430_v60 = vadd.f32 %v398_v26, %v238_v51 }
 0x131   :  { %v653_v4 = vadd.f32 %v512_v21, %v429_v39  ;;  %v253_v21 = vmul.f32 %v3874_v48, %v3620_v62  ;;  %v1394_v48 = vld [vmem:[%s5252_s6 + $0xb8] sm:$0xff] }
 0x133   :  { %v685_v12 = vmax.f32 %v653_v4, 0.0 }
 0x134   :  { %860 = vperm.xlu2 %3332, %v774_v49  }
 0x135   :  { %v527_v20 = vpop.permute.xlu1 %526  ;;  %875 = vperm.xlu0 %3298, %v777_v10   ;;  %855 = vperm.xlu1 %3331, %v773_v16  }
 0x136   :  { %v656_v41 = vadd.f32 %v527_v20, %v432_v7  ;;  %v3930_v27 = vpop.permute.xlu2 %278 }
 0x137   :  { %v502_v16 = vpop.permute.xlu0 %501 }
 0x138   :  { %v688_v46 = vmax.f32 %v656_v41, 0.0 }
 0x13a   :  { %v748_v59 = vpack.c.bf16 %v688_v46, %v687_v0  ;;  %v1377_v46 = vld [vmem:[%s5252_s6 + $0x30] sm:$0xff]  ;;  %v781_v0 = vld [vmem:[%s5250_s4 + $0xa0] sm:$0xff] }
 0x13c   :  { %845 = vperm.xlu2 %3332, %v771_v23   ;;  %1117 = vmatpush.bf16.msra.mxu0 %v748_v59  ;;  %v414_v23 = vmul.f32 %v3895_v58, %v3625_v63 }
 0x13d   :  { %3263 = vmatpush.bf16.msra.mxu2 %v748_v59  ;;  %1480 = vperm.xlu0 %3298, %v1386_v11   ;;  %v254_v11 = vmul.f32 %v3864_v43, %v3620_v62 }
 0x13e   :  { %940 = vperm.xlu1 %3331, %v790_v24   ;;  %v347_v32 = vpop.permute.xlu1 %346 }
 0x13f   :  { %v413_v20 = vmul.f32 %v347_v32, %v3625_v63  ;;  %v446_v32 = vadd.f32 %v414_v23, %v254_v11 }
 0x140   :  { %v3951_v42 = vpop.permute.xlu2 %165 }
 0x141   :  { %v445_v59 = vadd.f32 %v413_v20, %v253_v21  ;;  %v3176_v20 = vld [vmem:[%s5249_s3 + $0xa4] sm:$0xf0] }
 0x143   :  { %v669_v29 = vadd.f32 %v592_v3, %v445_v59  ;;  %v251_v59 = vmul.f32 %v3951_v42, %v3620_v62  ;;  %v1384_v42 = vld [vmem:[%s5252_s6 + $0x68] sm:$0xff] }
 0x144   :  { %930 = vperm.xlu2 %3332, %v788_v33   ;;  %v4020_v33 = vpop.permute.xlu0 %160 }
 0x145   :  { %1465 = vperm.xlu0 %3298, %v1383_v35   ;;  %v701_v35 = vmax.f32 %v669_v29, 0.0  ;;  %v252_v29 = vmul.f32 %v3944_v40, %v3620_v62 }
 0x146   :  { %925 = vperm.xlu1 %3331, %v787_v13  }
 0x147   :  { %v607_v1 = vpop.permute.xlu1 %606 }
 0x148   :  { %v672_v45 = vadd.f32 %v607_v1, %v448_v17  ;;  %v1391_v17 = vld [vmem:[%s5252_s6 + $0xa0] sm:$0xff] }
 0x149   :  { %v3962_v54 = vpop.permute.xlu2 %342  ;;  %v761_v1 = vld [vmem:[%s5250_s4] sm:$0xff] }
 0x14a   :  { %v704_v57 = vmax.f32 %v672_v45, 0.0 }
 0x14c   :  { %915 = vperm.xlu2 %3332, %v785_v47   ;;  %v756_v52 = vpack.c.bf16 %v704_v57, %v703_v28  ;;  %v4038_v57 = vpop.permute.xlu0 %581 }
 0x14d   :  { %1550 = vperm.xlu0 %3298, %v1400_v38   ;;  %v235_v38 = vmul.f32 %v3918_v18, %v3620_v62  ;;  %v234_v18 = vmul.f32 %v3983_v55, %v3620_v62 }
 0x14e   :  { %840 = vperm.xlu1 %3331, %v770_v5   ;;  %1206 = vmatpush.bf16.msra.mxu1 %v756_v52  ;;  %v396_v5 = vmul.f32 %v3930_v27, %v3625_v63  ;;  %v1374_v27 = vld [vmem:[%s5252_s6 + $0x18] sm:$0xff] }
 0x14f   :  { %3271 = vmatpush.bf16.msra.mxu3 %v756_v52 }
 0x150   :  { %v3966_v30 = vpop.permute.xlu1 %274 }
 0x151   :  { %v395_v45 = vmul.f32 %v3966_v30, %v3625_v63  ;;  %v1385_v30 = vld [vmem:[%s5252_s6 + $0x70] sm:$0xff] }
 0x152   :  { %v76_v25 = vpop.permute.xlu2 %75 }
 0x153   :  { %v427_v52 = vadd.f32 %v395_v45, %v235_v38  ;;  %v233_v3 = vmul.f32 %v76_v25, %v3620_v62 }
 0x154   :  { %830 = vperm.xlu2 %3332, %v768_v44   ;;  %v236_v44 = vmul.f32 %v3903_v8, %v3620_v62  ;;  %v497_v55 = vpop.permute.xlu0 %496 }
 0x155   :  { %1535 = vperm.xlu0 %3298, %v1397_v36   ;;  %v778_v36 = vld [vmem:[%s5250_s4 + $0x88] sm:$0xff]  ;;  %v651_v39 = vadd.f32 %v502_v16, %v427_v52  ;;  %v2741_v16 = vld [vmem:[%s5249_s3] sm:$0xf] }
 0x156   :  { %825 = vperm.xlu1 %3331, %v767_v56   ;;  %v428_v26 = vadd.f32 %v396_v5, %v236_v44  ;;  %v1379_v44 = vld [vmem:[%s5252_s6 + $0x40] sm:$0xff] }
 0x159   :  { %v517_v6 = vpop.permute.xlu1 %516 }
 0x15a   :  { %v654_v14 = vadd.f32 %v517_v6, %v430_v60  ;;  %v683_v6 = vmax.f32 %v651_v39, 0.0  ;;  %v3175_v39 = vld [vmem:[%s5249_s3 + $0xa4] sm:$0xf] }
 0x15b   :  { %v271_v7 = vpop.permute.xlu2 %270 }
 0x15c   :  { %v686_v49 = vmax.f32 %v654_v14, 0.0  ;;  %815 = vperm.xlu2 %3332, %v765_v9   ;;  %v394_v53 = vmul.f32 %v271_v7, %v3625_v63  ;;  %v1402_v14 = vld [vmem:[%s5252_s6 + $0xf8] sm:$0xff]  ;;  %v3156_v7 = vld [vmem:[%s5249_s3 + $0x4] sm:$0xf0] }
 0x15d   :  { %1450 = vperm.xlu0 %3298, %v1380_v37   ;;  %v2742_v23 = vor.u32 %v3156_v7, %v2741_v16  ;;  %v2008_v16 = vld [vmem:[%s5254_s8 + $0xd8] sm:$0xff]  ;;  %v3157_v7 = vld [vmem:[%s5249_s3 + $0x14] sm:$0xf] }
 0x15e   :  { %910 = vperm.xlu1 %3331, %v784_v61   ;;  %v747_v10 = vpack.c.bf16 %v686_v49, %v685_v12  ;;  %v426_v56 = vadd.f32 %v394_v53, %v234_v18  ;;  %v1371_v49 = vld [vmem:[%s5252_s6] sm:$0xff]  ;;  %v1401_v12 = vld [vmem:[%s5252_s6 + $0xf0] sm:$0xff]  ;;  %v1994_v18 = vld [vmem:[%s5254_s8 + $0x68] sm:$0xff] }
 0x160   :  { %1118 = vmatpush.bf16.msra.mxu0 %v747_v10  ;;  %3264 = vmatpush.bf16.msra.mxu2 %v747_v10  ;;  %v650_v9 = vadd.f32 %v497_v55, %v426_v56  ;;  %v2743_v56 = vld [vmem:[%s5249_s3 + $0x8] sm:$0xf0] }
 0x161   :  { %v1396_v55 = vld [vmem:[%s5252_s6 + $0xc8] sm:$0xff] }
 0x162   :  { %v3998_v41 = vpop.permute.xlu1 %338  ;;  %v682_v10 = vmax.f32 %v650_v9, 0.0  ;;  %v2757_v9 = vld [vmem:[%s5249_s3 + $0x20] sm:$0xf] }
 0x164   :  { %900 = vperm.xlu2 %3332, %v782_v19   ;;  %v4012_v24 = vpop.permute.xlu2 %155  ;;  %v2821_v19 = vld [vmem:[%s5249_s3 + $0xa0] sm:$0xf] }
 0x165   :  { %1435 = vperm.xlu0 %3298, %v1377_v46   ;;  %v411_v46 = vmul.f32 %v3998_v41, %v3625_v63  ;;  %v2822_v11 = vor.u32 %v3176_v20, %v2821_v19  ;;  %v1388_v41 = vld [vmem:[%s5252_s6 + $0x88] sm:$0xff]  ;;  %v2751_v19 = vld [vmem:[%s5249_s3 + $0x18] sm:$0xf0] }
 0x166   :  { %895 = vperm.xlu1 %3331, %v781_v0   ;;  %v1378_v20 = vld [vmem:[%s5252_s6 + $0x38] sm:$0xff] }
 0x16b   :  { %v597_v58 = vpop.permute.xlu1 %596 }
 0x16c   :  { %v670_v43 = vadd.f32 %v597_v58, %v446_v32  ;;  %885 = vperm.xlu2 %3332, %v779_v31   ;;  %v1399_v31 = vld [vmem:[%s5252_s6 + $0xe0] sm:$0xff]  ;;  %v412_v32 = vmul.f32 %v3962_v54, %v3625_v63 }
 0x16d   :  { %1520 = vperm.xlu0 %3298, %v1394_v48   ;;  %v4031_v2 = vpop.permute.xlu2 %334  ;;  %v443_v48 = vadd.f32 %v411_v46, %v251_v59  ;;  %v3177_v46 = vld [vmem:[%s5249_s3 + $0xb4] sm:$0xf]  ;;  %v1376_v59 = vld [vmem:[%s5252_s6 + $0x28] sm:$0xff] }
 0x16e   :  { %v702_v50 = vmax.f32 %v670_v43, 0.0  ;;  %810 = vperm.xlu1 %3331, %v764_v34   ;;  %v444_v58 = vadd.f32 %v412_v32, %v252_v29  ;;  %v410_v43 = vmul.f32 %v4031_v2, %v3625_v63  ;;  %v1381_v2 = vld [vmem:[%s5252_s6 + $0x50] sm:$0xff] }
 0x16f   :  { %v667_v54 = vadd.f32 %v4038_v57, %v443_v48  ;;  %v2765_v32 = vld [vmem:[%s5249_s3 + $0x30] sm:$0xf]  ;;  %v3162_v48 = vld [vmem:[%s5249_s3 + $0x34] sm:$0xf0] }
 0x170   :  { %v755_v13 = vpack.c.bf16 %v702_v50, %v701_v35  ;;  %v1382_v35 = vld [vmem:[%s5252_s6 + $0x58] sm:$0xff]  ;;  %v2766_v29 = vor.u32 %v3162_v48, %v2765_v32 }
 0x171   :  { %v2570_v48 = vld [vmem:[%s5256_s10 + $0x18] sm:$0xff] }
 0x172   :  { %1207 = vmatpush.bf16.msra.mxu1 %v755_v13  ;;  %3272 = vmatpush.bf16.msra.mxu3 %v755_v13  ;;  %v250_v13 = vmul.f32 %v4020_v33, %v3620_v62  ;;  %v3158_v33 = vld [vmem:[%s5249_s3 + $0x14] sm:$0xf0] }
 0x174   :  { %v267_v47 = vpop.permute.xlu1 %266  ;;  %800 = vperm.xlu2 %3332, %v762_v15   ;;  %v442_v57 = vadd.f32 %v410_v43, %v250_v13  ;;  %v3159_v43 = vld [vmem:[%s5249_s3 + $0x24] sm:$0xf] }
 0x175   :  { %1505 = vperm.xlu0 %3298, %v1391_v17   ;;  %v393_v28 = vmul.f32 %v267_v47, %v3625_v63  ;;  %v2011_v17 = vld [vmem:[%s5254_s8 + $0xf0] sm:$0xff]  ;;  %v249_v47 = vmul.f32 %v4012_v24, %v3620_v62  ;;  %v3178_v62 = vld [vmem:[%s5249_s3 + $0xb4] sm:$0xf0]  ;;  %v3179_v13 = vld [vmem:[%s5249_s3 + $0xc4] sm:$0xf] }
 0x176   :  { %795 = vperm.xlu1 %3331, %v761_v1   ;;  %v492_v51 = vpop.permute.xlu2 %491  ;;  %v699_v1 = vmax.f32 %v667_v54, 0.0  ;;  %v1373_v54 = vld [vmem:[%s5252_s6 + $0x10] sm:$0xff] }
 0x177   :  { %v425_v22 = vadd.f32 %v393_v28, %v233_v3  ;;  %v2829_v28 = vld [vmem:[%s5249_s3 + $0xb0] sm:$0xf] }
 0x179   :  { %v649_v8 = vadd.f32 %v492_v51, %v425_v22  ;;  %v2823_v51 = vld [vmem:[%s5249_s3 + $0xa8] sm:$0xf0] }
 0x17b   :  { %v681_v37 = vmax.f32 %v649_v8, 0.0 }
 0x17c   :  { %1475 = vperm.xlu2 %3332, %v1385_v30   ;;  %v2830_v30 = vor.u32 %v3178_v62, %v2829_v28 }
 0x17d   :  { %1420 = vperm.xlu0 %3298, %v1374_v27   ;;  %v507_v25 = vpop.permute.xlu1 %506  ;;  %v745_v21 = vpack.c.bf16 %v682_v10, %v681_v37  ;;  %v2837_v37 = vld [vmem:[%s5249_s3 + $0xc0] sm:$0xf]  ;;  %v1393_v10 = vld [vmem:[%s5252_s6 + $0xb0] sm:$0xff] }
 0x17e   :  { %880 = vperm.xlu1 %3331, %v778_v36   ;;  %v652_v60 = vadd.f32 %v507_v25, %v428_v26  ;;  %v577_v45 = vpop.permute.xlu2 %576  ;;  %v3155_v36 = vld [vmem:[%s5249_s3 + $0x4] sm:$0xf]  ;;  %v1398_v26 = vld [vmem:[%s5252_s6 + $0xd8] sm:$0xff] }
 0x17f   :  { %v666_v24 = vadd.f32 %v577_v45, %v442_v57  ;;  %v2746_v8 = vor.u32 %v3155_v36, %v2743_v56  ;;  %v2773_v57 = vld [vmem:[%s5249_s3 + $0x40] sm:$0xf]  ;;  %v1996_v36 = vld [vmem:[%s5254_s8 + $0x78] sm:$0xff]  ;;  %v1999_v56 = vld [vmem:[%s5254_s8 + $0x90] sm:$0xff] }
 0x180   :  { %v684_v4 = vmax.f32 %v652_v60, 0.0  ;;  %v2826_v60 = vor.u32 %v3175_v39, %v2823_v51  ;;  %v2781_v39 = vld [vmem:[%s5249_s3 + $0x50] sm:$0xf]  ;;  %v3166_v51 = vld [vmem:[%s5249_s3 + $0x54] sm:$0xf0] }
 0x181   :  { %v698_v22 = vmax.f32 %v666_v24, 0.0  ;;  %v1387_v24 = vld [vmem:[%s5252_s6 + $0x80] sm:$0xff] }
 0x182   :  { %v746_v61 = vpack.c.bf16 %v684_v4, %v683_v6  ;;  %v1991_v4 = vld [vmem:[%s5254_s8 + $0x50] sm:$0xff]  ;;  %v1395_v6 = vld [vmem:[%s5252_s6 + $0xc0] sm:$0xff] }
 0x184   :  { %1560 = vperm.xlu2 %3332, %v1402_v14   ;;  %1119 = vmatpush.bf16.msra.mxu0 %v746_v61  ;;  %v3160_v14 = vld [vmem:[%s5249_s3 + $0x24] sm:$0xf0] }
 0x185   :  { %3265 = vmatpush.bf16.msra.mxu2 %v746_v61  ;;  %1405 = vperm.xlu0 %3298, %v1371_v49   ;;  %v3180_v61 = vld [vmem:[%s5249_s3 + $0xc4] sm:$0xf0]  ;;  %v2758_v49 = vor.u32 %v3160_v14, %v2757_v9  ;;  %v3163_v14 = vld [vmem:[%s5249_s3 + $0x44] sm:$0xf] }
 0x186   :  { %1555 = vperm.xlu1 %3331, %v1401_v12   ;;  %v331_v0 = vpop.permute.xlu1 %330  ;;  %v2838_v12 = vor.u32 %v3180_v61, %v2837_v37  ;;  %v1982_v9 = vld [vmem:[%s5254_s8 + $0x8] sm:$0xff]  ;;  %v2012_v61 = vld [vmem:[%s5254_s8 + $0xf8] sm:$0xff] }
 0x187   :  { %v409_v40 = vmul.f32 %v331_v0, %v3625_v63  ;;  %v2749_v63 = vld [vmem:[%s5249_s3 + $0x10] sm:$0xf]  ;;  %v2831_v0 = vld [vmem:[%s5249_s3 + $0xb8] sm:$0xf0]  ;;  %v2775_v37 = vld [vmem:[%s5249_s3 + $0x48] sm:$0xf0] }
 0x188   :  { %1120 = vmatpush.bf16.msra.mxu0 %v745_v21  ;;  %v2750_v3 = vor.u32 %v3158_v33, %v2749_v63  ;;  %v2853_v63 = vld [vmem:[%s5249_s3 + $0xe0] sm:$0xf]  ;;  %v3184_v33 = vld [vmem:[%s5249_s3 + $0xe4] sm:$0xf0] }
 0x189   :  { %3266 = vmatpush.bf16.msra.mxu2 %v745_v21  ;;  %v441_v5 = vadd.f32 %v409_v40, %v249_v47  ;;  %v2754_v21 = vor.u32 %v3157_v7, %v2751_v19  ;;  %v2839_v40 = vld [vmem:[%s5249_s3 + $0xc8] sm:$0xf0]  ;;  %v1389_v47 = vld [vmem:[%s5252_s6 + $0x90] sm:$0xff]  ;;  %v2854_v62 = vor.u32 %v3184_v33, %v2853_v63 }
 0x18a   :  { %v2791_v63 = vld [vmem:[%s5249_s3 + $0x68] sm:$0xf0] }
 0x18b   :  { %1121 = vmatmul.bf16.vlgmr.msra.gmra.mxu0 %v2742_v23  ;;  %v2834_v23 = vor.u32 %v3177_v46, %v2831_v0  ;;  %v2567_v46 = vld [vmem:[%s5256_s10] sm:$0xff]  ;;  %v2006_v33 = vld [vmem:[%s5254_s8 + $0xc8] sm:$0xff] }
 0x18c   :  { %1171 = vmatmul.bf16.vlgmr.msra.gmra.mxu2 %v2822_v11  ;;  %1545 = vperm.xlu2 %3332, %v1399_v31   ;;  %v2005_v11 = vld [vmem:[%s5254_s8 + $0xc0] sm:$0xff] }
 0x18d   :  { %1490 = vperm.xlu0 %3298, %v1388_v41   ;;  %v1375_v31 = vld [vmem:[%s5252_s6 + $0x20] sm:$0xff]  ;;  %v2845_v41 = vld [vmem:[%s5249_s3 + $0xd0] sm:$0xf] }
 0x18e   :  { %1470 = vperm.xlu1 %3331, %v1384_v42   ;;  %v3182_v42 = vld [vmem:[%s5249_s3 + $0xd4] sm:$0xf0]  ;;  %v2009_v0 = vld [vmem:[%s5254_s8 + $0xe0] sm:$0xff] }
 0x18f   :  { %v587_v34 = vpop.permute.xlu1 %586 }
 0x190   :  { %v668_v50 = vadd.f32 %v587_v34, %v444_v58  ;;  %v2846_v58 = vor.u32 %v3182_v42, %v2845_v41  ;;  %v1988_v34 = vld [vmem:[%s5254_s8 + $0x38] sm:$0xff]  ;;  %v3165_v41 = vld [vmem:[%s5249_s3 + $0x54] sm:$0xf] }
 0x191   :  { %v2783_v42 = vld [vmem:[%s5249_s3 + $0x58] sm:$0xf0] }
 0x192   :  { %v700_v15 = vmax.f32 %v668_v50, 0.0  ;;  %v2759_v50 = vld [vmem:[%s5249_s3 + $0x28] sm:$0xf0] }
 0x194   :  { %1460 = vperm.xlu2 %3332, %v1382_v35   ;;  %v754_v38 = vpack.c.bf16 %v700_v15, %v699_v1  ;;  %v1392_v35 = vld [vmem:[%s5252_s6 + $0xa8] sm:$0xff]  ;;  %v2762_v15 = vor.u32 %v3159_v43, %v2759_v50  ;;  %v1390_v1 = vld [vmem:[%s5252_s6 + $0x98] sm:$0xff] }
 0x195   :  { %2165 = vperm.xlu0 %3298, %v2011_v17   ;;  %v2842_v17 = vor.u32 %v3179_v13, %v2839_v40  ;;  %v2573_v13 = vld [vmem:[%s5256_s10 + $0x30] sm:$0xff]  ;;  %v1989_v40 = vld [vmem:[%s5254_s8 + $0x40] sm:$0xff] }
 0x196   :  { %1455 = vperm.xlu1 %3331, %v1381_v2   ;;  %1208 = vmatpush.bf16.msra.mxu1 %v754_v38  ;;  %v1985_v2 = vld [vmem:[%s5254_s8 + $0x20] sm:$0xff] }
 0x197   :  { %3273 = vmatpush.bf16.msra.mxu3 %v754_v38  ;;  %v572_v52 = vpop.permute.xlu1 %571  ;;  %v3164_v38 = vld [vmem:[%s5249_s3 + $0x44] sm:$0xf0] }
 0x198   :  { %v665_v53 = vadd.f32 %v572_v52, %v441_v5  ;;  %v2774_v28 = vor.u32 %v3164_v38, %v2773_v57  ;;  %v2002_v5 = vld [vmem:[%s5254_s8 + $0xa8] sm:$0xff]  ;;  %v3161_v52 = vld [vmem:[%s5249_s3 + $0x34] sm:$0xf]  ;;  %v3167_v38 = vld [vmem:[%s5249_s3 + $0x64] sm:$0xf] }
 0x19a   :  { %v697_v27 = vmax.f32 %v665_v53, 0.0  ;;  %v1372_v53 = vld [vmem:[%s5252_s6 + $0x8] sm:$0xff] }
 0x19b   :  { %1126 = vmatmul.bf16.gmra.mxu0 %v2750_v3  ;;  %v2767_v3 = vld [vmem:[%s5249_s3 + $0x38] sm:$0xf0] }
 0x19c   :  { %1176 = vmatmul.bf16.gmra.mxu2 %v2830_v30  ;;  %1445 = vperm.xlu2 %3332, %v1379_v44   ;;  %v753_v25 = vpack.c.bf16 %v698_v22, %v697_v27  ;;  %v3181_v30 = vld [vmem:[%s5249_s3 + $0xd4] sm:$0xf]  ;;  %v2847_v44 = vld [vmem:[%s5249_s3 + $0xd8] sm:$0xf0]  ;;  %v2770_v22 = vor.u32 %v3161_v52, %v2767_v3 }
 0x19d   :  { %2080 = vperm.xlu0 %3298, %v1994_v18   ;;  %v2850_v27 = vor.u32 %v3181_v30, %v2847_v44  ;;  %v2003_v52 = vld [vmem:[%s5254_s8 + $0xb0] sm:$0xff]  ;;  %v3172_v30 = vld [vmem:[%s5249_s3 + $0x84] sm:$0xf0] }
 0x19e   :  { %1540 = vperm.xlu1 %3331, %v1398_v26   ;;  %1209 = vmatpush.bf16.msra.mxu1 %v753_v25  ;;  %v1995_v26 = vld [vmem:[%s5254_s8 + $0x70] sm:$0xff] }
 0x19f   :  { %3274 = vmatpush.bf16.msra.mxu3 %v753_v25  ;;  %v4235_v45 = vpop.permute.xlu1 %870  ;;  %v2861_v25 = vld [vmem:[%s5249_s3 + $0xf0] sm:$0xf] }
 0x1a1   :  { %1210 = vmatmul.bf16.vlgmr.msra.gmra.mxu1 %v2746_v8  ;;  %v3186_v8 = vld [vmem:[%s5249_s3 + $0xf4] sm:$0xf0] }
 0x1a2   :  { %1260 = vmatmul.bf16.vlgmr.msra.gmra.mxu3 %v2826_v60 }
 0x1a4   :  { %1530 = vperm.xlu2 %3332, %v1396_v55   ;;  %v2782_v55 = vor.u32 %v3166_v51, %v2781_v39  ;;  %v2799_v39 = vld [vmem:[%s5249_s3 + $0x78] sm:$0xf0]  ;;  %v1986_v51 = vld [vmem:[%s5254_s8 + $0x28] sm:$0xff] }
 0x1a5   :  { %2065 = vperm.xlu0 %3298, %v1991_v4   ;;  %v2862_v4 = vor.u32 %v3186_v8, %v2861_v25 }
 0x1a6   :  { %1525 = vperm.xlu1 %3331, %v1395_v6   ;;  %v1993_v6 = vld [vmem:[%s5254_s8 + $0x60] sm:$0xff] }
 0x1a7   :  { %v4276_v18 = vpop.permute.xlu1 %855 }
 0x1ab   :  { %1131 = vmatmul.bf16.gmra.mxu0 %v2758_v49  ;;  %v3183_v49 = vld [vmem:[%s5249_s3 + $0xe4] sm:$0xf] }
 0x1ac   :  { %1181 = vmatmul.bf16.gmra.mxu2 %v2838_v12  ;;  %1515 = vperm.xlu2 %3332, %v1393_v10   ;;  %v2855_v12 = vld [vmem:[%s5249_s3 + $0xe8] sm:$0xf0]  ;;  %v4322_v10 = vpop.permute.xlu0 %865 }
 0x1ad   :  { %2150 = vperm.xlu0 %3298, %v2008_v16   ;;  %v2778_v16 = vor.u32 %v3163_v14, %v2775_v37  ;;  %v2858_v7 = vor.u32 %v3183_v49, %v2855_v12  ;;  %v1983_v14 = vld [vmem:[%s5254_s8 + $0x10] sm:$0xff]  ;;  %v3174_v49 = vld [vmem:[%s5249_s3 + $0x94] sm:$0xf0] }
 0x1ae   :  { %1440 = vperm.xlu1 %3331, %v1378_v20   ;;  %v2010_v20 = vld [vmem:[%s5254_s8 + $0xe8] sm:$0xff] }
 0x1b0   :  { %v4299_v60 = vpop.permute.xlu1 %940 }
 0x1b1   :  { %1215 = vmatmul.bf16.gmra.mxu1 %v2754_v21  ;;  %v2789_v21 = vld [vmem:[%s5249_s3 + $0x60] sm:$0xf] }
 0x1b2   :  { %1265 = vmatmul.bf16.gmra.mxu3 %v2834_v23  ;;  %v3168_v23 = vld [vmem:[%s5249_s3 + $0x64] sm:$0xf0] }
 0x1b4   :  { %1430 = vperm.xlu2 %3332, %v1376_v59   ;;  %v4341_v59 = vpop.permute.xlu0 %950 }
 0x1b5   :  { %2135 = vperm.xlu0 %3298, %v2005_v11   ;;  %v2790_v11 = vor.u32 %v3168_v23, %v2789_v21  ;;  %v2807_v21 = vld [vmem:[%s5249_s3 + $0x88] sm:$0xf0]  ;;  %v2000_v23 = vld [vmem:[%s5254_s8 + $0x98] sm:$0xff] }
 0x1b6   :  { %1425 = vperm.xlu1 %3331, %v1375_v31   ;;  %v2007_v31 = vld [vmem:[%s5254_s8 + $0xd0] sm:$0xff] }
 0x1b8   :  { %v4324_v19 = vpop.permute.xlu1 %925 }
 0x1bb   :  { %1136 = vmatmul.bf16.gmra.mxu0 %v2766_v29  ;;  %v1992_v29 = vld [vmem:[%s5254_s8 + $0x58] sm:$0xff] }
 0x1bc   :  { %1186 = vmatmul.bf16.gmra.mxu2 %v2846_v58  ;;  %1415 = vperm.xlu2 %3332, %v1373_v54   ;;  %v3185_v58 = vld [vmem:[%s5249_s3 + $0xf4] sm:$0xf]  ;;  %v2863_v54 = vld [vmem:[%s5249_s3 + $0xf8] sm:$0xf0]  ;;  %v4366_v50 = vpop.permute.xlu0 %935 }
 0x1bd   :  { %2050 = vperm.xlu0 %3298, %v1988_v34   ;;  %v2786_v34 = vor.u32 %v3165_v41, %v2783_v42  ;;  %v2866_v43 = vor.u32 %v3185_v58, %v2863_v54 }
 0x1be   :  { %1510 = vperm.xlu1 %3331, %v1392_v35   ;;  %v1990_v35 = vld [vmem:[%s5254_s8 + $0x48] sm:$0xff] }
 0x1c0   :  { %v4346_v32 = vpop.permute.xlu1 %840 }
 0x1c1   :  { %1220 = vmatmul.bf16.gmra.mxu1 %v2762_v15 }
 0x1c2   :  { %1270 = vmatmul.bf16.gmra.mxu3 %v2842_v17  ;;  %v2797_v17 = vld [vmem:[%s5249_s3 + $0x70] sm:$0xf] }
 0x1c4   :  { %1500 = vperm.xlu2 %3332, %v1390_v1   ;;  %v3170_v1 = vld [vmem:[%s5249_s3 + $0x74] sm:$0xf0]  ;;  %v4388_v57 = vpop.permute.xlu0 %850 }
 0x1c5   :  { %2035 = vperm.xlu0 %3298, %v1985_v2   ;;  %v2798_v2 = vor.u32 %v3170_v1, %v2797_v17 }
 0x1c6   :  { %1495 = vperm.xlu1 %3331, %v1389_v47   ;;  %v1987_v47 = vld [vmem:[%s5254_s8 + $0x30] sm:$0xff] }
 0x1c8   :  { %v4377_v15 = vpop.permute.xlu1 %825 }
 0x1cb   :  { %1141 = vmatmul.bf16.gmra.mxu0 %v2774_v28  ;;  %v2794_v28 = vor.u32 %v3167_v38, %v2791_v63  ;;  %v2569_v63 = vld [vmem:[%s5256_s10 + $0x10] sm:$0xff] }
 0x1cc   :  { %1191 = vmatmul.bf16.gmra.mxu2 %v2854_v62  ;;  %1485 = vperm.xlu2 %3332, %v1387_v24   ;;  %v4401_v24 = vpop.permute.xlu2 %945  ;;  %v4409_v3 = vpop.permute.xlu0 %835 }
 0x1cd   :  { %2120 = vperm.xlu0 %3298, %v2002_v5   ;;  %v2004_v5 = vld [vmem:[%s5254_s8 + $0xb8] sm:$0xff] }
 0x1ce   :  { %1410 = vperm.xlu1 %3331, %v1372_v53   ;;  %v2805_v53 = vld [vmem:[%s5249_s3 + $0x80] sm:$0xf] }
 0x1cf   :  { %v2806_v44 = vor.u32 %v3172_v30, %v2805_v53 }
 0x1d0   :  { %v4399_v62 = vpop.permute.xlu1 %910 }
 0x1d1   :  { %1225 = vmatmul.bf16.gmra.mxu1 %v2770_v22 }
 0x1d2   :  { %1275 = vmatmul.bf16.gmra.mxu3 %v2850_v27 }
 0x1d4   :  { %2090 = vperm.xlu2 %3332, %v1996_v36   ;;  %v2001_v36 = vld [vmem:[%s5254_s8 + $0xa0] sm:$0xff]  ;;  %v4431_v8 = vpop.permute.xlu0 %920 }
 0x1d5   :  { %2105 = vperm.xlu0 %3298, %v1999_v56   ;;  %v4420_v56 = vpop.permute.xlu2 %860 }
 0x1d6   :  { %2085 = vperm.xlu1 %3331, %v1995_v26   ;;  %v3169_v26 = vld [vmem:[%s5249_s3 + $0x74] sm:$0xf] }
 0x1d7   :  { %v2802_v25 = vor.u32 %v3169_v26, %v2799_v39  ;;  %v2572_v26 = vld [vmem:[%s5256_s10 + $0x28] sm:$0xff] }
 0x1d8   :  { %v896_v22 = vpop.permute.xlu1 %895 }
 0x1db   :  { %1146 = vmatmul.bf16.gmra.mxu0 %v2782_v55 }
 0x1dc   :  { %1196 = vmatmul.bf16.gmra.mxu2 %v2862_v4  ;;  %2075 = vperm.xlu2 %3332, %v1993_v6   ;;  %v1984_v6 = vld [vmem:[%s5254_s8 + $0x18] sm:$0xff] }
 0x1dd   :  { %2020 = vperm.xlu0 %3298, %v1982_v9   ;;  %v4443_v37 = vpop.permute.xlu2 %845 }
 0x1de   :  { %2170 = vperm.xlu1 %3331, %v2012_v61   ;;  %v2813_v61 = vld [vmem:[%s5249_s3 + $0x90] sm:$0xf] }
 0x1e0   :  { %v4438_v9 = vpop.permute.xlu1 %810 }
 0x1e1   :  { %1230 = vmatmul.bf16.gmra.mxu1 %v2778_v16  ;;  %5259 = vst [vmem:[#allocation6_spill] sm:$0xff] %v4438_v9  ;;  %v2814_v16 = vor.u32 %v3174_v49, %v2813_v61 }
 0x1e2   :  { %1280 = vmatmul.bf16.gmra.mxu3 %v2858_v7  ;;  %v906_v7 = vpop.permute.xlu0 %905 }
 0x1e4   :  { %2160 = vperm.xlu2 %3332, %v2010_v20  }
 0x1e5   :  { %2577 = vperm.xlu0 %3298, %v2567_v46   ;;  %v1981_v46 = vld [vmem:[%s5254_s8] sm:$0xff]  ;;  %v4465_v41 = vpop.permute.xlu2 %930 }
 0x1e6   :  { %2155 = vperm.xlu1 %3331, %v2009_v0   ;;  %v3171_v0 = vld [vmem:[%s5249_s3 + $0x84] sm:$0xf] }
 0x1eb   :  { %1151 = vmatmul.bf16.gmra.mxu0 %v2790_v11  ;;  %v796_v11 = vpop.permute.xlu1 %795 }
 0x1ec   :  { %2145 = vperm.xlu2 %3332, %v2007_v31  }
 0x1ed   :  { %2592 = vperm.xlu0 %3298, %v2570_v48   ;;  %v2810_v48 = vor.u32 %v3171_v0, %v2807_v21 }
 0x1ee   :  { %2070 = vperm.xlu1 %3331, %v1992_v29  }
 0x1f1   :  { %1235 = vmatmul.bf16.gmra.mxu1 %v2786_v34  ;;  %v1998_v34 = vld [vmem:[%s5254_s8 + $0x88] sm:$0xff] }
 0x1f2   :  { %1285 = vmatmul.bf16.gmra.mxu3 %v2866_v43  ;;  %v4474_v43 = vpop.permute.xlu0 %820 }
 0x1f4   :  { %2060 = vperm.xlu2 %3332, %v1990_v35   ;;  %v1997_v35 = vld [vmem:[%s5254_s8 + $0x80] sm:$0xff] }
 0x1f5   :  { %2607 = vperm.xlu0 %3298, %v2573_v13  }
 0x1f6   :  { %2055 = vperm.xlu1 %3331, %v1989_v40  }
 0x1fb   :  { %1156 = vmatmul.bf16.gmra.mxu0 %v2798_v2  ;;  %v916_v2 = vpop.permute.xlu2 %915 }
 0x1fc   :  { %2045 = vperm.xlu2 %3332, %v1987_v47  }
 0x1fe   :  { %2140 = vperm.xlu1 %3331, %v2006_v33   ;;  %v3173_v33 = vld [vmem:[%s5249_s3 + $0x94] sm:$0xf] }
 0x201   :  { %1240 = vmatmul.bf16.gmra.mxu1 %v2794_v28  ;;  %v2815_v28 = vld [vmem:[%s5249_s3 + $0x98] sm:$0xf0] }
 0x203   :  { %v4506_v39 = vpop.permute.xlu2 %830 }
 0x204   :  { %2130 = vperm.xlu2 %3332, %v2004_v5   ;;  %v2568_v5 = vld [vmem:[%s5256_s10 + $0x8] sm:$0xff] }
 0x206   :  { %2125 = vperm.xlu1 %3331, %v2003_v52   ;;  %v806_v52 = vpop.permute.xlu0 %805 }
 0x208   :  { %v1122_v27 = vpop.f32.mrf.mxu0 }
 0x209   :  { %v1123_v31 = vadd.f32 %v1122_v27, %v796_v11 }
 0x20b   :  { %1161 = vmatmul.bf16.gmra.mxu0 %v2806_v44  ;;  %v2818_v44 = vor.u32 %v3173_v33, %v2815_v28 }
 0x20c   :  { %2115 = vperm.xlu2 %3332, %v2001_v36  }
 0x20e   :  { %2040 = vperm.xlu1 %3331, %v1986_v51  }
 0x20f   :  { %v1172_v55 = vpop.f32.mrf.mxu2 }
 0x210   :  { %v4433_v4 = vpop.f32.mrf.mxu0  ;;  %v1173_v13 = vadd.f32 %v1172_v55, %v896_v22 }
 0x211   :  { %5258 = vst [vmem:[#allocation5_spill] sm:$0xff] %v4433_v4  ;;  %1245 = vmatmul.bf16.gmra.mxu1 %v2802_v25  ;;  %v2571_v25 = vld [vmem:[%s5256_s10 + $0x20] sm:$0xff] }
 0x214   :  { %2030 = vperm.xlu2 %3332, %v1984_v6  }
 0x216   :  { %2025 = vperm.xlu1 %3331, %v1983_v14  }
 0x217   :  { %v4451_v12 = vpop.f32.mrf.mxu2 }
 0x218   :  { %v1127_v20 = vpop.f32.mrf.mxu0 }
 0x219   :  { %v1128_v53 = vadd.f32 %v1127_v20, %v806_v52  ;;  %v816_v20 = vpop.permute.xlu2 %815 }
 0x21b   :  { %1166 = vmatmul.bf16.gmra.mxu0 %v2814_v16  ;;  %v2574_v16 = vld [vmem:[%s5256_s10 + $0x38] sm:$0xff] }
 0x21c   :  { %2015 = vperm.xlu2 %3332, %v1981_v46  }
 0x21e   :  { %2110 = vperm.xlu1 %3331, %v2000_v23   ;;  %v1211_v42 = vpop.f32.mrf.mxu1 }
 0x21f   :  { %v1177_v29 = vpop.f32.mrf.mxu2  ;;  %v4467_v58 = vadd.f32 %v1211_v42, %v1123_v31 }
 0x220   :  { %v4469_v54 = vpop.f32.mrf.mxu0  ;;  %v1178_v55 = vadd.f32 %v1177_v29, %v906_v7 }
 0x221   :  { %5260 = vst [vmem:[#allocation7_spill] sm:$0xff] %v4467_v58  ;;  %1250 = vmatmul.bf16.gmra.mxu1 %v2810_v48 }
 0x222   :  { %5261 = vst [vmem:[#allocation8_spill] sm:$0xff] %v4469_v54 }
 0x224   :  { %2100 = vperm.xlu2 %3332, %v1998_v34  }
 0x225   :  { %v1261_v40 = vpop.f32.mrf.mxu3 }
 0x226   :  { %v4479_v17 = vadd.f32 %v1261_v40, %v1173_v13  ;;  %2095 = vperm.xlu1 %3331, %v1997_v35   ;;  %v4481_v1 = vpop.f32.mrf.mxu1 }
 0x227   :  { %5262 = vst [vmem:[#allocation9_spill] sm:$0xff] %v4481_v1  ;;  %v4483_v38 = vpop.f32.mrf.mxu2 }
 0x228   :  { %v1132_v47 = vpop.f32.mrf.mxu0 }
 0x229   :  { %v1133_v46 = vadd.f32 %v1132_v47, %v816_v20 }
 0x22c   :  { %2587 = vperm.xlu2 %3332, %v2569_v63  }
 0x22d   :  { %v4497_v30 = vpop.f32.mrf.mxu3 }
 0x22e   :  { %2582 = vperm.xlu1 %3331, %v2568_v5   ;;  %v1216_v22 = vpop.f32.mrf.mxu1 }
 0x22f   :  { %v4499_v27 = vadd.f32 %v1216_v22, %v1128_v53  ;;  %v1182_v51 = vpop.f32.mrf.mxu2 }
 0x230   :  { %v4501_v36 = vpop.f32.mrf.mxu0  ;;  %v1183_v31 = vadd.f32 %v1182_v51, %v916_v2 }
 0x231   :  { %5263 = vst [vmem:[#allocation10_spill] sm:$0xff] %v4499_v27  ;;  %1255 = vmatmul.bf16.gmra.mxu1 %v2818_v44 }
 0x234   :  { %2602 = vperm.xlu2 %3332, %v2572_v26  }
 0x235   :  { %v1266_v6 = vpop.f32.mrf.mxu3 }
 0x236   :  { %v4511_v14 = vadd.f32 %v1266_v6, %v1178_v55  ;;  %2597 = vperm.xlu1 %3331, %v2571_v25   ;;  %v4513_v61 = vpop.f32.mrf.mxu1 }
 0x237   :  { %5264 = vst [vmem:[#allocation11_spill] sm:$0xff] %v4513_v61  ;;  %v1184_v0 = vpop.f32.mrf.mxu2 }
 0x238   :  { %v1137_v49 = vpop.f32.mrf.mxu0 }
 0x239   :  { %v1138_v13 = vadd.f32 %v1137_v49, %v4377_v15 }
 0x23d   :  { %v4518_v21 = vpop.f32.mrf.mxu3 }
 0x23e   :  { %2612 = vperm.xlu1 %3331, %v2574_v16   ;;  %v1221_v23 = vpop.f32.mrf.mxu1 }
 0x23f   :  { %v4520_v7 = vadd.f32 %v1221_v23, %v1133_v46  ;;  %v1187_v34 = vpop.f32.mrf.mxu2 }
 0x240   :  { %v4522_v11 = vpop.f32.mrf.mxu0 }
 0x241   :  { %5265 = vst [vmem:[#allocation12_spill] sm:$0xff] %v4520_v7 }
 0x245   :  { %v1271_v48 = vpop.f32.mrf.mxu3 }
 0x246   :  { %v4524_v42 = vadd.f32 %v1271_v48, %v1183_v31  ;;  %v4526_v29 = vpop.f32.mrf.mxu1 }
 0x247   :  { %5266 = vst [vmem:[#allocation13_spill] sm:$0xff] %v4526_v29  ;;  %v1189_v28 = vpop.f32.mrf.mxu2  ;;  %v1188_v29 = vadd.f32 %v1187_v34, %v4324_v19 }
 0x248   :  { %v1142_v35 = vpop.f32.mrf.mxu0  ;;  %v1190_v4 = vadd.f32 %v1189_v28, %v4465_v41  ;;  %v1180_v41 = vadd.f32 %v4483_v38, %v4399_v62  ;;  %v1313_v62 = vmax.f32 %v4511_v14, 0.0  ;;  %v1311_v28 = vmax.f32 %v4479_v17, 0.0 }
 0x249   :  { %v1143_v44 = vadd.f32 %v1142_v35, %v4409_v3 }
 0x24d   :  { %v1273_v40 = vpop.f32.mrf.mxu3 }
 0x24e   :  { %v1226_v47 = vpop.f32.mrf.mxu1 }
 0x24f   :  { %v4529_v63 = vadd.f32 %v1226_v47, %v1138_v13  ;;  %v1192_v53 = vpop.f32.mrf.mxu2 }
 0x250   :  { %v4531_v33 = vpop.f32.mrf.mxu0  ;;  %v1193_v58 = vadd.f32 %v1192_v53, %v4366_v50 }
 0x251   :  { %5267 = vst [vmem:[#allocation14_spill] sm:$0xff] %v4529_v63 }
 0x255   :  { %v1276_v5 = vpop.f32.mrf.mxu3 }
 0x256   :  { %v4533_v52 = vpop.f32.mrf.mxu1 }
 0x257   :  { %v1194_v25 = vpop.f32.mrf.mxu2 }
 0x258   :  { %v4535_v2 = vpop.f32.mrf.mxu0  ;;  %v1195_v13 = vadd.f32 %v1194_v25, %v4299_v60  ;;  %v1277_v25 = vadd.f32 %v1276_v5, %v1188_v29 }
 0x25d   :  { %v1278_v22 = vpop.f32.mrf.mxu3 }
 0x25e   :  { %v1231_v26 = vpop.f32.mrf.mxu1 }
 0x25f   :  { %v4538_v51 = vadd.f32 %v1231_v26, %v1143_v44  ;;  %v1197_v46 = vpop.f32.mrf.mxu2 }
 0x260   :  { %v4540_v15 = vpop.f32.mrf.mxu0  ;;  %v1198_v35 = vadd.f32 %v1197_v46, %v4401_v24  ;;  %v1279_v24 = vadd.f32 %v1278_v22, %v1190_v4 }
 0x262   :  { %v1318_v53 = vmax.f32 %v1279_v24, 0.0 }
 0x265   :  { %v1281_v55 = vpop.f32.mrf.mxu3 }
 0x266   :  { %v4542_v6 = vpop.f32.mrf.mxu1  ;;  %v1282_v61 = vadd.f32 %v1281_v55, %v1193_v58  ;;  %v1317_v58 = vmax.f32 %v1277_v25, 0.0 }
 0x267   :  { %v1199_v3 = vpop.f32.mrf.mxu2 }
 0x268   :  { %v1152_v49 = vpop.f32.mrf.mxu0  ;;  %v1200_v47 = vadd.f32 %v1199_v3, %v4341_v59  ;;  %v1185_v59 = vadd.f32 %v1184_v0, %v4431_v8 }
 0x26a   :  { %v1274_v50 = vadd.f32 %v1273_v40, %v1185_v59 }
 0x26c   :  { %v1316_v19 = vmax.f32 %v1274_v50, 0.0 }
 0x26d   :  { %v1283_v16 = vpop.f32.mrf.mxu3 }
 0x26e   :  { %v4544_v20 = vpop.f32.mrf.mxu1  ;;  %v1284_v27 = vadd.f32 %v1283_v16, %v1195_v13 }
 0x270   :  { %v1154_v31 = vpop.f32.mrf.mxu0  ;;  %v1320_v46 = vmax.f32 %v1284_v27, 0.0  ;;  %v1368_v27 = vpack.c.bf16 %v1318_v53, %v1317_v58 }
 0x275   :  { %v1286_v23 = vpop.f32.mrf.mxu3 }
 0x276   :  { %v4546_v48 = vpop.f32.mrf.mxu1  ;;  %v1287_v44 = vadd.f32 %v1286_v23, %v1198_v35  ;;  %v1319_v23 = vmax.f32 %v1282_v61, 0.0  ;;  %v1315_v61 = vmax.f32 %v4524_v42, 0.0  ;;  %v1153_v35 = vadd.f32 %v1152_v49, %v4276_v18 }
 0x278   :  { %v1321_v63 = vmax.f32 %v1287_v44, 0.0  ;;  %v1157_v54 = vpop.f32.mrf.mxu0  ;;  %v1369_v3 = vpack.c.bf16 %v1320_v46, %v1319_v23  ;;  %v1367_v40 = vpack.c.bf16 %v1316_v19, %v1315_v61  ;;  %v1148_v44 = vadd.f32 %v4535_v2, %v4443_v37 }
 0x279   :  { %v1140_v37 = vadd.f32 %v4522_v11, %v4506_v39  ;;  %v5269_v39 = vld [vmem:[#allocation6_spill] sm:$0xff]  ;;  %v5270_v11 = vld [vmem:[#allocation8_spill] sm:$0xff] }
 0x27a   :  { %v1237_v18 = vadd.f32 %v4544_v20, %v1148_v44  ;;  %v1299_v20 = vmax.f32 %v4538_v51, 0.0  ;;  %v5273_v51 = vld [vmem:[#allocation5_spill] sm:$0xff] }
 0x27c   :  { %v1301_v2 = vmax.f32 %v1237_v18, 0.0 }
 0x27d   :  { %v1288_v26 = vpop.f32.mrf.mxu3 }
 0x27e   :  { %v1289_v1 = vadd.f32 %v1288_v26, %v1200_v47  ;;  %v1241_v7 = vpop.f32.mrf.mxu1  ;;  %v1145_v26 = vadd.f32 %v4531_v33, %v4346_v32  ;;  %v1135_v33 = vadd.f32 %v4501_v36, %v4474_v43  ;;  %v891_v43 = vpop.permute.xlu0 %890 }
 0x280   :  { %v1322_v9 = vmax.f32 %v1289_v1, 0.0  ;;  %v1269_v1 = vadd.f32 %v4518_v21, %v1180_v41  ;;  %v1159_v4 = vpop.f32.mrf.mxu0  ;;  %v1158_v21 = vadd.f32 %v1157_v54, %v4322_v10  ;;  %v1150_v10 = vadd.f32 %v4540_v15, %v4388_v57  ;;  %v5271_v41 = vld [vmem:[#allocation14_spill] sm:$0xff] }
 0x281   :  { %v1160_v42 = vadd.f32 %v1159_v4, %v4235_v45  ;;  %v1242_v54 = vadd.f32 %v1241_v7, %v1153_v35  ;;  %v1234_v57 = vadd.f32 %v4542_v6, %v1145_v26  ;;  %v5268_v6 = vld [vmem:[#allocation13_spill] sm:$0xff]  ;;  %v1297_v58 = vmax.f32 %v5271_v41, 0.0  ;;  %v3193_v41 = vld [vmem:[%s5251_s5 + $0x34] sm:$0xf] }
 0x282   :  { %v1370_v60 = vpack.c.bf16 %v1322_v9, %v1321_v63  ;;  %v901_v9 = vpop.permute.xlu2 %900  ;;  %v1314_v29 = vmax.f32 %v1269_v1, 0.0  ;;  %v1224_v23 = vadd.f32 %v5268_v6, %v1135_v33 }
 0x283   :  { %v1175_v8 = vadd.f32 %v4451_v12, %v901_v9  ;;  %v1155_v12 = vadd.f32 %v1154_v31, %v4420_v56  ;;  %v1239_v56 = vadd.f32 %v4546_v48, %v1150_v10  ;;  %v1303_v49 = vmax.f32 %v1242_v54, 0.0  ;;  %v5274_v9 = vld [vmem:[#allocation12_spill] sm:$0xff]  ;;  %v3188_v10 = vld [vmem:[%s5251_s5 + $0x4] sm:$0xf0] }
 0x284   :  { %1812 = vmatpush.bf16.msrb.mxu3 %v1370_v60  ;;  %v1366_v63 = vpack.c.bf16 %v1314_v29, %v1313_v62  ;;  %v1229_v60 = vadd.f32 %v4533_v52, %v1140_v37  ;;  %v1300_v59 = vmax.f32 %v1234_v57, 0.0  ;;  %v5272_v52 = vld [vmem:[#allocation11_spill] sm:$0xff]  ;;  %v1296_v19 = vmax.f32 %v1224_v23, 0.0  ;;  %v5276_v62 = vld [vmem:[#allocation10_spill] sm:$0xff]  ;;  %v3191_v23 = vld [vmem:[%s5251_s5 + $0x24] sm:$0xf] }
 0x285   :  { %v1264_v0 = vadd.f32 %v4497_v30, %v1175_v8  ;;  %v1302_v7 = vmax.f32 %v1239_v56, 0.0  ;;  %v1295_v8 = vmax.f32 %v5274_v9, 0.0  ;;  %v2903_v9 = vld [vmem:[%s5251_s5 + $0x48] sm:$0xf0] }
 0x286   :  { %v1243_v16 = vpop.f32.mrf.mxu1  ;;  %v1298_v50 = vmax.f32 %v1229_v60, 0.0  ;;  %v1359_v53 = vpack.c.bf16 %v1300_v59, %v1299_v20  ;;  %v876_v54 = vpop.permute.xlu0 %875  ;;  %v3189_v59 = vld [vmem:[%s5251_s5 + $0x14] sm:$0xf]  ;;  %v2885_v20 = vld [vmem:[%s5251_s5 + $0x20] sm:$0xf] }
 0x287   :  { %v1312_v38 = vmax.f32 %v1264_v0, 0.0  ;;  %v1244_v14 = vadd.f32 %v1243_v16, %v1155_v12  ;;  %v1360_v32 = vpack.c.bf16 %v1302_v7, %v1301_v2  ;;  %v5275_v0 = vld [vmem:[#allocation9_spill] sm:$0xff] }
 0x288   :  { %1813 = vmatpush.bf16.msrb.mxu3 %v1369_v3  ;;  %v4564_v5 = vpop.f32.mrf.mxu0  ;;  %v1130_v3 = vadd.f32 %v5270_v11, %v5269_v39  ;;  %v1358_v4 = vpack.c.bf16 %v1298_v50, %v1297_v58  ;;  %v2887_v50 = vld [vmem:[%s5251_s5 + $0x28] sm:$0xf0]  ;;  %v3194_v39 = vld [vmem:[%s5251_s5 + $0x34] sm:$0xf0]  ;;  %v2895_v58 = vld [vmem:[%s5251_s5 + $0x38] sm:$0xf0] }
 0x289   :  { %v1365_v55 = vpack.c.bf16 %v1312_v38, %v1311_v28  ;;  %v1304_v45 = vmax.f32 %v1244_v14, 0.0  ;;  %v1293_v38 = vmax.f32 %v5276_v62, 0.0 }
 0x28a   :  { %v886_v48 = vpop.permute.xlu2 %885  ;;  %v1219_v1 = vadd.f32 %v5272_v52, %v1130_v3  ;;  %v2898_v52 = vor.u32 %v3193_v41, %v2895_v58 }
 0x28b   :  { %v1361_v15 = vpack.c.bf16 %v1304_v45, %v1303_v49 }
 0x28c   :  { %1814 = vmatpush.bf16.msrb.mxu3 %v1368_v27 }
 0x28e   :  { %v1246_v34 = vpop.f32.mrf.mxu1  ;;  %v4637_v3 = vpop.permute.xlu0 %1480 }
 0x28f   :  { %v1247_v30 = vadd.f32 %v1246_v34, %v1158_v21  ;;  %v1294_v34 = vmax.f32 %v1219_v1, 0.0 }
 0x290   :  { %1815 = vmatpush.bf16.msrb.mxu3 %v1367_v40  ;;  %v1164_v24 = vpop.f32.mrf.mxu0  ;;  %v1357_v40 = vpack.c.bf16 %v1296_v19, %v1295_v8 }
 0x291   :  { %v1305_v17 = vmax.f32 %v1247_v30, 0.0  ;;  %v1356_v12 = vpack.c.bf16 %v1294_v34, %v1293_v38  ;;  %v5277_v30 = vld [vmem:[#allocation7_spill] sm:$0xff]  ;;  %v3198_v34 = vld [vmem:[%s5251_s5 + $0x54] sm:$0xf0] }
 0x292   :  { %v801_v36 = vpop.permute.xlu2 %800 }
 0x293   :  { %v1125_v27 = vadd.f32 %v5273_v51, %v801_v36 }
 0x294   :  { %1816 = vmatpush.bf16.msrb.mxu3 %v1366_v63 }
 0x295   :  { %v1214_v29 = vadd.f32 %v5275_v0, %v1125_v27  ;;  %v3195_v27 = vld [vmem:[%s5251_s5 + $0x44] sm:$0xf] }
 0x296   :  { %v1248_v22 = vpop.f32.mrf.mxu1  ;;  %v4647_v19 = vpop.permute.xlu0 %1465 }
 0x297   :  { %v1249_v13 = vadd.f32 %v1248_v22, %v1160_v42  ;;  %v1292_v21 = vmax.f32 %v1214_v29, 0.0  ;;  %v881_v42 = vpop.permute.xlu1 %880  ;;  %v1291_v22 = vmax.f32 %v5277_v30, 0.0  ;;  %v2909_v29 = vld [vmem:[%s5251_s5 + $0x50] sm:$0xf] }
 0x298   :  { %1817 = vmatpush.bf16.msrb.mxu3 %v1365_v55  ;;  %v1167_v16 = vpop.f32.mrf.mxu0  ;;  %v1165_v55 = vadd.f32 %v1164_v24, %v881_v42  ;;  %v2910_v62 = vor.u32 %v3198_v34, %v2909_v29 }
 0x299   :  { %v1306_v47 = vmax.f32 %v1249_v13, 0.0  ;;  %v1168_v28 = vadd.f32 %v1167_v16, %v886_v48  ;;  %v2869_v13 = vld [vmem:[%s5251_s5] sm:$0xf]  ;;  %v1355_v45 = vpack.c.bf16 %v1292_v21, %v1291_v22  ;;  %v3190_v48 = vld [vmem:[%s5251_s5 + $0x14] sm:$0xf0] }
 0x29a   :  { %v2893_v16 = vld [vmem:[%s5251_s5 + $0x30] sm:$0xf]  ;;  %v4665_v0 = vpop.permute.xlu2 %1475  ;;  %v2911_v21 = vld [vmem:[%s5251_s5 + $0x58] sm:$0xf0]  ;;  %v2917_v22 = vld [vmem:[%s5251_s5 + $0x60] sm:$0xf] }
 0x29b   :  { %v1362_v31 = vpack.c.bf16 %v1306_v47, %v1305_v17  ;;  %v1163_v47 = vadd.f32 %v4564_v5, %v876_v54  ;;  %v2871_v5 = vld [vmem:[%s5251_s5 + $0x8] sm:$0xf0]  ;;  %v2894_v11 = vor.u32 %v3194_v39, %v2893_v16  ;;  %v3199_v54 = vld [vmem:[%s5251_s5 + $0x64] sm:$0xf]  ;;  %v3206_v16 = vld [vmem:[%s5251_s5 + $0x94] sm:$0xf0] }
 0x29d   :  { %1723 = vmatpush.bf16.msrb.mxu2 %v1362_v31  ;;  %v2870_v31 = vor.u32 %v3188_v10, %v2869_v13 }
 0x29e   :  { %v1251_v46 = vpop.f32.mrf.mxu1  ;;  %v4663_v8 = vpop.permute.xlu0 %1550 }
 0x29f   :  { %v1252_v26 = vadd.f32 %v1251_v46, %v1163_v47  ;;  %v2877_v46 = vld [vmem:[%s5251_s5 + $0x10] sm:$0xf]  ;;  %v4645_v1 = vpop.permute.xlu1 %1555 }
 0x2a0   :  { %v1169_v63 = vpop.f32.mrf.mxu0  ;;  %v2878_v60 = vor.u32 %v3190_v48, %v2877_v46 }
 0x2a1   :  { %1724 = vmatpush.bf16.msrb.mxu2 %v1361_v15  ;;  %v1170_v35 = vadd.f32 %v1169_v63, %v891_v43  ;;  %v1307_v7 = vmax.f32 %v1252_v26, 0.0  ;;  %v3187_v15 = vld [vmem:[%s5251_s5 + $0x4] sm:$0xf]  ;;  %v3196_v43 = vld [vmem:[%s5251_s5 + $0x44] sm:$0xf0] }
 0x2a2   :  { %v2874_v2 = vor.u32 %v3187_v15, %v2871_v5  ;;  %v3197_v63 = vld [vmem:[%s5251_s5 + $0x54] sm:$0xf] }
 0x2a5   :  { %1725 = vmatpush.bf16.msrb.mxu2 %v1360_v32  ;;  %v2879_v32 = vld [vmem:[%s5251_s5 + $0x18] sm:$0xf0] }
 0x2a6   :  { %v1253_v25 = vpop.f32.mrf.mxu1  ;;  %v2882_v33 = vor.u32 %v3189_v59, %v2879_v32  ;;  %v4675_v38 = vpop.permute.xlu0 %1535  ;;  %v3203_v32 = vld [vmem:[%s5251_s5 + $0x84] sm:$0xf] }
 0x2a7   :  { %v1254_v44 = vadd.f32 %v1253_v25, %v1165_v55  ;;  %v3192_v25 = vld [vmem:[%s5251_s5 + $0x24] sm:$0xf0]  ;;  %v4655_v51 = vpop.permute.xlu1 %1470 }
 0x2a8   :  { %v2886_v6 = vor.u32 %v3192_v25, %v2885_v20  ;;  %v3200_v55 = vld [vmem:[%s5251_s5 + $0x64] sm:$0xf0] }
 0x2a9   :  { %1726 = vmatpush.bf16.msrb.mxu2 %v1359_v53  ;;  %v1308_v24 = vmax.f32 %v1254_v44, 0.0  ;;  %v2890_v53 = vor.u32 %v3191_v23, %v2887_v50 }
 0x2ab   :  { %v1363_v37 = vpack.c.bf16 %v1308_v24, %v1307_v7  ;;  %v3201_v24 = vld [vmem:[%s5251_s5 + $0x74] sm:$0xf] }
 0x2ad   :  { %1727 = vmatpush.bf16.msrb.mxu2 %v1358_v4  ;;  %v2901_v4 = vld [vmem:[%s5251_s5 + $0x40] sm:$0xf] }
 0x2ae   :  { %v1256_v61 = vpop.f32.mrf.mxu1  ;;  %v2902_v36 = vor.u32 %v3196_v43, %v2901_v4  ;;  %v4687_v30 = vpop.permute.xlu0 %1450 }
 0x2af   :  { %v1257_v14 = vadd.f32 %v1256_v61, %v1168_v28  ;;  %v2906_v61 = vor.u32 %v3195_v27, %v2903_v9  ;;  %v4683_v28 = vpop.permute.xlu2 %1560  ;;  %v2943_v27 = vld [vmem:[%s5251_s5 + $0x98] sm:$0xf0] }
 0x2b1   :  { %1728 = vmatpush.bf16.msrb.mxu2 %v1357_v40  ;;  %v1309_v18 = vmax.f32 %v1257_v14, 0.0  ;;  %v4673_v40 = vpop.permute.xlu1 %1455 }
 0x2b5   :  { %1729 = vmatpush.bf16.msrb.mxu2 %v1356_v12  ;;  %v2914_v12 = vor.u32 %v3197_v63, %v2911_v21 }
 0x2b6   :  { %v1258_v17 = vpop.f32.mrf.mxu1  ;;  %v4699_v10 = vpop.permute.xlu0 %1435 }
 0x2b7   :  { %v1259_v56 = vadd.f32 %v1258_v17, %v1170_v35  ;;  %v2918_v35 = vor.u32 %v3200_v55, %v2917_v22  ;;  %v4695_v14 = vpop.permute.xlu2 %1545  ;;  %v2919_v17 = vld [vmem:[%s5251_s5 + $0x68] sm:$0xf0]  ;;  %v2949_v55 = vld [vmem:[%s5251_s5 + $0xa0] sm:$0xf] }
 0x2b8   :  { %v2922_v47 = vor.u32 %v3199_v54, %v2919_v17 }
 0x2b9   :  { %v1310_v49 = vmax.f32 %v1259_v56, 0.0  ;;  %1730 = vmatpush.bf16.msrb.mxu2 %v1355_v45  ;;  %v4685_v42 = vpop.permute.xlu1 %1540  ;;  %v2925_v45 = vld [vmem:[%s5251_s5 + $0x70] sm:$0xf] }
 0x2bb   :  { %v1364_v57 = vpack.c.bf16 %v1310_v49, %v1309_v18 }
 0x2bc   :  { %1731 = vmatmul.bf16.vlgmr.msrb.gmra.mxu2 %v2870_v31  ;;  %v3202_v31 = vld [vmem:[%s5251_s5 + $0x74] sm:$0xf0] }
 0x2bd   :  { %1818 = vmatpush.bf16.msrb.mxu3 %v1364_v57  ;;  %v2926_v18 = vor.u32 %v3202_v31, %v2925_v45  ;;  %v2927_v57 = vld [vmem:[%s5251_s5 + $0x78] sm:$0xf0] }
 0x2be   :  { %v4717_v26 = vpop.permute.xlu0 %1520  ;;  %v2930_v15 = vor.u32 %v3201_v24, %v2927_v57  ;;  %v2951_v24 = vld [vmem:[%s5251_s5 + $0xa8] sm:$0xf0] }
 0x2bf   :  { %v4707_v44 = vpop.permute.xlu2 %1460 }
 0x2c1   :  { %1819 = vmatpush.bf16.msrb.mxu3 %v1363_v37  ;;  %v4697_v13 = vpop.permute.xlu1 %1525  ;;  %v2933_v37 = vld [vmem:[%s5251_s5 + $0x80] sm:$0xf] }
 0x2c4   :  { %1820 = vmatmul.bf16.vlgmr.msrb.gmra.mxu3 %v2874_v2  ;;  %v3204_v2 = vld [vmem:[%s5251_s5 + $0x84] sm:$0xf0] }
 0x2c5   :  { %v2934_v48 = vor.u32 %v3204_v2, %v2933_v37 }
 0x2c6   :  { %v4727_v5 = vpop.permute.xlu0 %1505 }
 0x2c7   :  { %v4719_v49 = vpop.permute.xlu2 %1445 }
 0x2c9   :  { %v4709_v56 = vpop.permute.xlu1 %1440 }
 0x2cc   :  { %1736 = vmatmul.bf16.gmra.mxu2 %v2878_v60 }
 0x2ce   :  { %v1421_v59 = vpop.permute.xlu0 %1420 }
 0x2cf   :  { %v4735_v46 = vpop.permute.xlu2 %1530 }
 0x2d1   :  { %v1426_v7 = vpop.permute.xlu1 %1425 }
 0x2d4   :  { %1825 = vmatmul.bf16.gmra.mxu3 %v2882_v33  ;;  %v2935_v33 = vld [vmem:[%s5251_s5 + $0x88] sm:$0xf0] }
 0x2d5   :  { %v2938_v25 = vor.u32 %v3203_v32, %v2935_v33 }
 0x2d6   :  { %v1406_v50 = vpop.permute.xlu0 %1405 }
 0x2d9   :  { %v4737_v60 = vpop.permute.xlu1 %1510 }
 0x2dc   :  { %1741 = vmatmul.bf16.gmra.mxu2 %v2886_v6  ;;  %v4745_v6 = vpop.permute.xlu2 %1515 }
 0x2e1   :  { %v4747_v23 = vpop.permute.xlu1 %1495 }
 0x2e4   :  { %1830 = vmatmul.bf16.gmra.mxu3 %v2890_v53  ;;  %v2941_v53 = vld [vmem:[%s5251_s5 + $0x90] sm:$0xf]  ;;  %v1431_v4 = vpop.permute.xlu2 %1430 }
 0x2e9   :  { %v1411_v43 = vpop.permute.xlu1 %1410 }
 0x2ec   :  { %1746 = vmatmul.bf16.gmra.mxu2 %v2894_v11  ;;  %v1416_v22 = vpop.permute.xlu2 %1415 }
 0x2f4   :  { %1835 = vmatmul.bf16.gmra.mxu3 %v2898_v52  ;;  %v2942_v52 = vor.u32 %v3206_v16, %v2941_v53 }
 0x2fc   :  { %1751 = vmatmul.bf16.gmra.mxu2 %v2902_v36  ;;  %v3205_v36 = vld [vmem:[%s5251_s5 + $0x94] sm:$0xf] }
 0x304   :  { %1840 = vmatmul.bf16.gmra.mxu3 %v2906_v61 }
 0x30c   :  { %1756 = vmatmul.bf16.gmra.mxu2 %v2910_v62  ;;  %v2946_v62 = vor.u32 %v3205_v36, %v2943_v27 }
 0x314   :  { %1845 = vmatmul.bf16.gmra.mxu3 %v2914_v12 }
 0x31c   :  { %1761 = vmatmul.bf16.gmra.mxu2 %v2918_v35  ;;  %v3208_v35 = vld [vmem:[%s5251_s5 + $0xa4] sm:$0xf0] }
 0x31d   :  { %v2950_v31 = vor.u32 %v3208_v35, %v2949_v55  ;;  %v3211_v35 = vld [vmem:[%s5251_s5 + $0xc4] sm:$0xf] }
 0x324   :  { %1850 = vmatmul.bf16.gmra.mxu3 %v2922_v47 }
 0x32c   :  { %1766 = vmatmul.bf16.gmra.mxu2 %v2926_v18  ;;  %v3207_v18 = vld [vmem:[%s5251_s5 + $0xa4] sm:$0xf] }
 0x334   :  { %1855 = vmatmul.bf16.gmra.mxu3 %v2930_v15 }
 0x33c   :  { %1771 = vmatmul.bf16.gmra.mxu2 %v2934_v48  ;;  %v2954_v48 = vor.u32 %v3207_v18, %v2951_v24 }
 0x33f   :  { %v1732_v20 = vpop.f32.mrf.mxu2 }
 0x340   :  { %v1733_v39 = vadd.f32 %v1732_v20, %v1406_v50  ;;  %v3210_v50 = vld [vmem:[%s5251_s5 + $0xb4] sm:$0xf0] }
 0x344   :  { %1860 = vmatmul.bf16.gmra.mxu3 %v2938_v25  ;;  %v2957_v25 = vld [vmem:[%s5251_s5 + $0xb0] sm:$0xf] }
 0x347   :  { %v1734_v11 = vpop.f32.mrf.mxu2  ;;  %v1821_v41 = vpop.f32.mrf.mxu3 }
 0x348   :  { %v1822_v58 = vadd.f32 %v1821_v41, %v1733_v39  ;;  %v1735_v9 = vadd.f32 %v1734_v11, %v1411_v43  ;;  %v2958_v11 = vor.u32 %v3210_v50, %v2957_v25  ;;  %v3209_v41 = vld [vmem:[%s5251_s5 + $0xb4] sm:$0xf]  ;;  %v2975_v50 = vld [vmem:[%s5251_s5 + $0xd8] sm:$0xf0] }
 0x349   :  { %v3213_v25 = vld [vmem:[%s5251_s5 + $0xd4] sm:$0xf] }
 0x34a   :  { %v1901_v63 = vmax.f32 %v1822_v58, 0.0  ;;  %v2959_v58 = vld [vmem:[%s5251_s5 + $0xb8] sm:$0xf0] }
 0x34c   :  { %1776 = vmatmul.bf16.gmra.mxu2 %v2942_v52 }
 0x34f   :  { %v1737_v61 = vpop.f32.mrf.mxu2  ;;  %v1823_v29 = vpop.f32.mrf.mxu3 }
 0x350   :  { %v1824_v34 = vadd.f32 %v1823_v29, %v1735_v9  ;;  %v1738_v54 = vadd.f32 %v1737_v61, %v1416_v22  ;;  %v2962_v9 = vor.u32 %v3209_v41, %v2959_v58 }
 0x352   :  { %v1902_v21 = vmax.f32 %v1824_v34, 0.0  ;;  %v2965_v34 = vld [vmem:[%s5251_s5 + $0xc0] sm:$0xf] }
 0x354   :  { %1865 = vmatmul.bf16.gmra.mxu3 %v2946_v62  ;;  %v4761_v12 = vpack.c.bf16 %v1902_v21, %v1901_v63  ;;  %v3212_v62 = vld [vmem:[%s5251_s5 + $0xc4] sm:$0xf0] }
 0x355   :  { %v2966_v55 = vor.u32 %v3212_v62, %v2965_v34 }
 0x357   :  { %v1739_v17 = vpop.f32.mrf.mxu2  ;;  %v1826_v47 = vpop.f32.mrf.mxu3 }
 0x358   :  { %v1827_v45 = vadd.f32 %v1826_v47, %v1738_v54  ;;  %v1740_v57 = vadd.f32 %v1739_v17, %v1421_v59  ;;  %v2967_v54 = vld [vmem:[%s5251_s5 + $0xc8] sm:$0xf0] }
 0x359   :  { %v2970_v18 = vor.u32 %v3211_v35, %v2967_v54 }
 0x35a   :  { %v1903_v32 = vmax.f32 %v1827_v45, 0.0 }
 0x35c   :  { %1781 = vmatmul.bf16.gmra.mxu2 %v2950_v31 }
 0x35f   :  { %v1742_v15 = vpop.f32.mrf.mxu2  ;;  %v1828_v37 = vpop.f32.mrf.mxu3 }
 0x360   :  { %v1829_v2 = vadd.f32 %v1828_v37, %v1740_v57  ;;  %v1743_v53 = vadd.f32 %v1742_v15, %v1426_v7  ;;  %v2973_v15 = vld [vmem:[%s5251_s5 + $0xd0] sm:$0xf]  ;;  %v3214_v37 = vld [vmem:[%s5251_s5 + $0xd4] sm:$0xf0] }
 0x362   :  { %v1904_v33 = vmax.f32 %v1829_v2, 0.0 }
 0x364   :  { %1870 = vmatmul.bf16.gmra.mxu3 %v2954_v48  ;;  %v4775_v20 = vpack.c.bf16 %v1904_v33, %v1903_v32  ;;  %v2974_v33 = vor.u32 %v3214_v37, %v2973_v15 }
 0x367   :  { %v1744_v16 = vpop.f32.mrf.mxu2  ;;  %v1831_v59 = vpop.f32.mrf.mxu3 }
 0x368   :  { %v1832_v39 = vadd.f32 %v1831_v59, %v1743_v53  ;;  %v1745_v52 = vadd.f32 %v1744_v16, %v1431_v4  ;;  %v2978_v59 = vor.u32 %v3213_v25, %v2975_v50 }
 0x36a   :  { %v1905_v61 = vmax.f32 %v1832_v39, 0.0  ;;  %v3216_v39 = vld [vmem:[%s5251_s5 + $0xe4] sm:$0xf0] }
 0x36c   :  { %1786 = vmatmul.bf16.gmra.mxu2 %v2958_v11 }
 0x36f   :  { %v1747_v43 = vpop.f32.mrf.mxu2  ;;  %v1833_v36 = vpop.f32.mrf.mxu3 }
 0x370   :  { %v1834_v27 = vadd.f32 %v1833_v36, %v1745_v52  ;;  %v1748_v63 = vadd.f32 %v1747_v43, %v4699_v10  ;;  %v3215_v52 = vld [vmem:[%s5251_s5 + $0xe4] sm:$0xf]  ;;  %v2983_v43 = vld [vmem:[%s5251_s5 + $0xe8] sm:$0xf0] }
 0x372   :  { %v1906_v7 = vmax.f32 %v1834_v27, 0.0 }
 0x374   :  { %1875 = vmatmul.bf16.gmra.mxu3 %v2962_v9  ;;  %v4789_v29 = vpack.c.bf16 %v1906_v7, %v1905_v61  ;;  %v2986_v9 = vor.u32 %v3215_v52, %v2983_v43  ;;  %v2989_v61 = vld [vmem:[%s5251_s5 + $0xf0] sm:$0xf]  ;;  %v3218_v7 = vld [vmem:[%s5251_s5 + $0xf4] sm:$0xf0] }
 0x377   :  { %v1749_v4 = vpop.f32.mrf.mxu2  ;;  %v1836_v21 = vpop.f32.mrf.mxu3 }
 0x378   :  { %v1837_v22 = vadd.f32 %v1836_v21, %v1748_v63  ;;  %v1750_v17 = vadd.f32 %v1749_v4, %v4709_v56  ;;  %v2990_v63 = vor.u32 %v3218_v7, %v2989_v61  ;;  %v3217_v4 = vld [vmem:[%s5251_s5 + $0xf4] sm:$0xf]  ;;  %v2991_v21 = vld [vmem:[%s5251_s5 + $0xf8] sm:$0xf0] }
 0x379   :  { %v2994_v35 = vor.u32 %v3217_v4, %v2991_v21 }
 0x37a   :  { %v1907_v10 = vmax.f32 %v1837_v22, 0.0 }
 0x37c   :  { %1791 = vmatmul.bf16.gmra.mxu2 %v2966_v55 }
 0x37f   :  { %v1752_v47 = vpop.f32.mrf.mxu2  ;;  %v1838_v45 = vpop.f32.mrf.mxu3 }
 0x380   :  { %v1839_v31 = vadd.f32 %v1838_v45, %v1750_v17  ;;  %v1753_v2 = vadd.f32 %v1752_v47, %v4719_v49  ;;  %v2981_v49 = vld [vmem:[%s5251_s5 + $0xe0] sm:$0xf]  ;;  %v1501_v47 = vpop.permute.xlu2 %1500 }
 0x381   :  { %v2982_v58 = vor.u32 %v3216_v39, %v2981_v49 }
 0x382   :  { %v1908_v24 = vmax.f32 %v1839_v31, 0.0 }
 0x384   :  { %1880 = vmatmul.bf16.gmra.mxu3 %v2970_v18  ;;  %v4805_v57 = vpack.c.bf16 %v1908_v24, %v1907_v10 }
 0x387   :  { %v1754_v56 = vpop.f32.mrf.mxu2  ;;  %v1841_v48 = vpop.f32.mrf.mxu3 }
 0x388   :  { %v4814_v32 = vadd.f32 %v1841_v48, %v1753_v2 }
 0x38c   :  { %1796 = vmatmul.bf16.gmra.mxu2 %v2974_v33 }
 0x38f   :  { %v1757_v53 = vpop.f32.mrf.mxu2  ;;  %v1843_v16 = vpop.f32.mrf.mxu3 }
 0x390   :  { %v1758_v49 = vadd.f32 %v1757_v53, %v4673_v40  ;;  %v1491_v53 = vpop.permute.xlu0 %1490 }
 0x394   :  { %1885 = vmatmul.bf16.gmra.mxu3 %v2978_v59 }
 0x397   :  { %v1759_v11 = vpop.f32.mrf.mxu2  ;;  %v1846_v41 = vpop.f32.mrf.mxu3 }
 0x398   :  { %v1760_v33 = vadd.f32 %v1759_v11, %v4707_v44  ;;  %v1847_v52 = vadd.f32 %v1846_v41, %v1758_v49 }
 0x39c   :  { %1801 = vmatmul.bf16.gmra.mxu2 %v2982_v58 }
 0x39f   :  { %v1762_v36 = vpop.f32.mrf.mxu2  ;;  %v1848_v27 = vpop.f32.mrf.mxu3 }
 0x3a0   :  { %v1763_v37 = vadd.f32 %v1762_v36, %v4647_v19  ;;  %v1849_v39 = vadd.f32 %v1848_v27, %v1760_v33  ;;  %v1909_v27 = vmax.f32 %v4814_v32, 0.0  ;;  %v3005_v33 = vld [vmem:[%s5253_s7 + $0x10] sm:$0xf] }
 0x3a2   :  { %v1912_v7 = vmax.f32 %v1849_v39, 0.0 }
 0x3a4   :  { %1890 = vmatmul.bf16.gmra.mxu3 %v2986_v9 }
 0x3a7   :  { %v1764_v34 = vpop.f32.mrf.mxu2  ;;  %v1851_v62 = vpop.f32.mrf.mxu3 }
 0x3a8   :  { %v1765_v31 = vadd.f32 %v1764_v34, %v4655_v51  ;;  %v1852_v25 = vadd.f32 %v1851_v62, %v1763_v37  ;;  %v1486_v51 = vpop.permute.xlu2 %1485  ;;  %v1911_v34 = vmax.f32 %v1847_v52, 0.0 }
 0x3aa   :  { %v1913_v43 = vmax.f32 %v1852_v25, 0.0  ;;  %v1970_v40 = vpack.c.bf16 %v1912_v7, %v1911_v34  ;;  %v3222_v25 = vld [vmem:[%s5253_s7 + $0x14] sm:$0xf0] }
 0x3ab   :  { %v3006_v49 = vor.u32 %v3222_v25, %v3005_v33 }
 0x3ac   :  { %1806 = vmatmul.bf16.gmra.mxu2 %v2990_v63 }
 0x3af   :  { %v1767_v22 = vpop.f32.mrf.mxu2  ;;  %v1853_v55 = vpop.f32.mrf.mxu3 }
 0x3b0   :  { %v1768_v45 = vadd.f32 %v1767_v22, %v4665_v0  ;;  %v1854_v2 = vadd.f32 %v1853_v55, %v1765_v31  ;;  %v3220_v31 = vld [vmem:[%s5253_s7 + $0x4] sm:$0xf0] }
 0x3b2   :  { %v1914_v0 = vmax.f32 %v1854_v2, 0.0 }
 0x3b4   :  { %1895 = vmatmul.bf16.gmra.mxu3 %v2994_v35  ;;  %v1971_v11 = vpack.c.bf16 %v1914_v0, %v1913_v43  ;;  %v3013_v43 = vld [vmem:[%s5253_s7 + $0x20] sm:$0xf] }
 0x3b7   :  { %v1769_v54 = vpop.f32.mrf.mxu2  ;;  %v1856_v17 = vpop.f32.mrf.mxu3 }
 0x3b8   :  { %v1770_v18 = vadd.f32 %v1769_v54, %v4637_v3  ;;  %v1857_v10 = vadd.f32 %v1856_v17, %v1768_v45  ;;  %v1755_v3 = vadd.f32 %v1754_v56, %v4687_v30  ;;  %v2997_v45 = vld [vmem:[%s5253_s7] sm:$0xf] }
 0x3ba   :  { %v1915_v50 = vmax.f32 %v1857_v10, 0.0  ;;  %v1844_v61 = vadd.f32 %v1843_v16, %v1755_v3 }
 0x3bc   :  { %v1910_v62 = vmax.f32 %v1844_v61, 0.0 }
 0x3be   :  { %v1969_v4 = vpack.c.bf16 %v1910_v62, %v1909_v27  ;;  %v3226_v27 = vld [vmem:[%s5253_s7 + $0x34] sm:$0xf0] }
 0x3bf   :  { %v1772_v24 = vpop.f32.mrf.mxu2  ;;  %v1858_v15 = vpop.f32.mrf.mxu3 }
 0x3c0   :  { %v1859_v48 = vadd.f32 %v1858_v15, %v1770_v18  ;;  %v1773_v9 = vadd.f32 %v1772_v24, %v1486_v51 }
 0x3c2   :  { %v1916_v59 = vmax.f32 %v1859_v48, 0.0 }
 0x3c4   :  { %v1972_v58 = vpack.c.bf16 %v1916_v59, %v1915_v50 }
 0x3c6   :  { %2333 = vmatpush.bf16.msrb.mxu0 %v1972_v58 }
 0x3c7   :  { %v1774_v19 = vpop.f32.mrf.mxu2  ;;  %v1861_v36 = vpop.f32.mrf.mxu3 }
 0x3c8   :  { %v1862_v44 = vadd.f32 %v1861_v36, %v1773_v9  ;;  %v1775_v63 = vadd.f32 %v1774_v19, %v1491_v53  ;;  %v3224_v9 = vld [vmem:[%s5253_s7 + $0x24] sm:$0xf0]  ;;  %v3021_v53 = vld [vmem:[%s5253_s7 + $0x30] sm:$0xf] }
 0x3c9   :  { %v3014_v7 = vor.u32 %v3224_v9, %v3013_v43 }
 0x3ca   :  { %2334 = vmatpush.bf16.msrb.mxu0 %v1971_v11  ;;  %v1917_v21 = vmax.f32 %v1862_v44, 0.0 }
 0x3ce   :  { %2335 = vmatpush.bf16.msrb.mxu0 %v1970_v40 }
 0x3cf   :  { %v1777_v30 = vpop.f32.mrf.mxu2  ;;  %v1863_v56 = vpop.f32.mrf.mxu3 }
 0x3d0   :  { %v1864_v41 = vadd.f32 %v1863_v56, %v1775_v63  ;;  %v1778_v55 = vadd.f32 %v1777_v30, %v4747_v23  ;;  %v3022_v56 = vor.u32 %v3226_v27, %v3021_v53  ;;  %v3007_v53 = vld [vmem:[%s5253_s7 + $0x18] sm:$0xf0] }
 0x3d2   :  { %v1918_v22 = vmax.f32 %v1864_v41, 0.0  ;;  %2336 = vmatpush.bf16.msrb.mxu0 %v1969_v4 }
 0x3d4   :  { %v4854_v16 = vpack.c.bf16 %v1918_v22, %v1917_v21  ;;  %v3228_v21 = vld [vmem:[%s5253_s7 + $0x44] sm:$0xf0] }
 0x3d6   :  { %2337 = vmatpush.bf16.msrb.mxu0 %v4805_v57  ;;  %v2998_v57 = vor.u32 %v3220_v31, %v2997_v45  ;;  %v3230_v45 = vld [vmem:[%s5253_s7 + $0x54] sm:$0xf0] }
 0x3d7   :  { %v1779_v35 = vpop.f32.mrf.mxu2  ;;  %v1866_v54 = vpop.f32.mrf.mxu3 }
 0x3d8   :  { %v1867_v17 = vadd.f32 %v1866_v54, %v1778_v55  ;;  %v1780_v32 = vadd.f32 %v1779_v35, %v1501_v47 }
 0x3da   :  { %2338 = vmatpush.bf16.msrb.mxu0 %v4789_v29  ;;  %v1919_v24 = vmax.f32 %v1867_v17, 0.0 }
 0x3de   :  { %2339 = vmatpush.bf16.msrb.mxu0 %v4775_v20 }
 0x3df   :  { %v1782_v18 = vpop.f32.mrf.mxu2  ;;  %v1868_v23 = vpop.f32.mrf.mxu3 }
 0x3e0   :  { %v1869_v10 = vadd.f32 %v1868_v23, %v1780_v32  ;;  %v1783_v20 = vadd.f32 %v1782_v18, %v4727_v5  ;;  %v3037_v32 = vld [vmem:[%s5253_s7 + $0x50] sm:$0xf] }
 0x3e1   :  { %v3038_v23 = vor.u32 %v3230_v45, %v3037_v32 }
 0x3e2   :  { %v1920_v15 = vmax.f32 %v1869_v10, 0.0  ;;  %2340 = vmatpush.bf16.msrb.mxu0 %v4761_v12 }
 0x3e4   :  { %v4867_v29 = vpack.c.bf16 %v1920_v15, %v1919_v24 }
 0x3e5   :  { %2341 = vmatmul.bf16.vlgmr.msrb.gmra.mxu0 %v2998_v57 }
 0x3e7   :  { %v1784_v47 = vpop.f32.mrf.mxu2  ;;  %v1871_v37 = vpop.f32.mrf.mxu3 }
 0x3e8   :  { %v1872_v2 = vadd.f32 %v1871_v37, %v1783_v20  ;;  %v1785_v48 = vadd.f32 %v1784_v47, %v4737_v60  ;;  %v3045_v37 = vld [vmem:[%s5253_s7 + $0x60] sm:$0xf] }
 0x3ea   :  { %v1921_v39 = vmax.f32 %v1872_v2, 0.0  ;;  %v3232_v2 = vld [vmem:[%s5253_s7 + $0x64] sm:$0xf0] }
 0x3ef   :  { %v1787_v50 = vpop.f32.mrf.mxu2  ;;  %v1873_v12 = vpop.f32.mrf.mxu3 }
 0x3f0   :  { %v1874_v59 = vadd.f32 %v1873_v12, %v1785_v48  ;;  %v1788_v58 = vadd.f32 %v1787_v50, %v4745_v6  ;;  %v3046_v12 = vor.u32 %v3232_v2, %v3045_v37  ;;  %v5005_v37 = vpop.permute.xlu1 %2085 }
 0x3f2   :  { %v1922_v0 = vmax.f32 %v1874_v59, 0.0 }
 0x3f4   :  { %v4877_v5 = vpack.c.bf16 %v1922_v0, %v1921_v39 }
 0x3f5   :  { %2346 = vmatmul.bf16.gmra.mxu0 %v3006_v49 }
 0x3f7   :  { %v1789_v60 = vpop.f32.mrf.mxu2  ;;  %v1876_v51 = vpop.f32.mrf.mxu3 }
 0x3f8   :  { %v1877_v3 = vadd.f32 %v1876_v51, %v1788_v58  ;;  %v1790_v52 = vadd.f32 %v1789_v60, %v4717_v26 }
 0x3fa   :  { %v1923_v44 = vmax.f32 %v1877_v3, 0.0 }
 0x3ff   :  { %v1792_v19 = vpop.f32.mrf.mxu2  ;;  %v1878_v36 = vpop.f32.mrf.mxu3 }
 0x400   :  { %v1879_v61 = vadd.f32 %v1878_v36, %v1790_v52  ;;  %v1793_v34 = vadd.f32 %v1792_v19, %v4697_v13  ;;  %v3029_v13 = vld [vmem:[%s5253_s7 + $0x40] sm:$0xf] }
 0x401   :  { %v3030_v35 = vor.u32 %v3228_v21, %v3029_v13  ;;  %v4967_v21 = vpop.permute.xlu2 %2090 }
 0x402   :  { %v1924_v11 = vmax.f32 %v1879_v61, 0.0 }
 0x404   :  { %v4887_v6 = vpack.c.bf16 %v1924_v11, %v1923_v44  ;;  %v3061_v44 = vld [vmem:[%s5253_s7 + $0x80] sm:$0xf]  ;;  %v3236_v11 = vld [vmem:[%s5253_s7 + $0x84] sm:$0xf0] }
 0x405   :  { %2351 = vmatmul.bf16.gmra.mxu0 %v3014_v7 }
 0x407   :  { %v1794_v26 = vpop.f32.mrf.mxu2  ;;  %v1881_v62 = vpop.f32.mrf.mxu3 }
 0x408   :  { %v1882_v40 = vadd.f32 %v1881_v62, %v1793_v34  ;;  %v1795_v60 = vadd.f32 %v1794_v26, %v4735_v46  ;;  %v3234_v46 = vld [vmem:[%s5253_s7 + $0x74] sm:$0xf0]  ;;  %v3219_v34 = vld [vmem:[%s5253_s7 + $0x4] sm:$0xf]  ;;  %v3062_v26 = vor.u32 %v3236_v11, %v3061_v44 }
 0x409   :  { %v3238_v62 = vld [vmem:[%s5253_s7 + $0x94] sm:$0xf0]  ;;  %v4985_v45 = vpop.permute.xlu2 %2075 }
 0x40a   :  { %v1925_v36 = vmax.f32 %v1882_v40, 0.0  ;;  %v3221_v40 = vld [vmem:[%s5253_s7 + $0x14] sm:$0xf] }
 0x40f   :  { %v1797_v63 = vpop.f32.mrf.mxu2  ;;  %v1883_v30 = vpop.f32.mrf.mxu3 }
 0x410   :  { %v1798_v49 = vadd.f32 %v1797_v63, %v4675_v38  ;;  %v3053_v38 = vld [vmem:[%s5253_s7 + $0x70] sm:$0xf]  ;;  %v3077_v63 = vld [vmem:[%s5253_s7 + $0xa0] sm:$0xf] }
 0x411   :  { %v3054_v7 = vor.u32 %v3234_v46, %v3053_v38 }
 0x415   :  { %2356 = vmatmul.bf16.gmra.mxu0 %v3022_v56  ;;  %v3223_v56 = vld [vmem:[%s5253_s7 + $0x24] sm:$0xf] }
 0x417   :  { %v1799_v41 = vpop.f32.mrf.mxu2  ;;  %v1886_v4 = vpop.f32.mrf.mxu3 }
 0x418   :  { %v1887_v51 = vadd.f32 %v1886_v4, %v1798_v49  ;;  %v3246_v49 = vld [vmem:[%s5253_s7 + $0xd4] sm:$0xf0] }
 0x41a   :  { %v1927_v9 = vmax.f32 %v1887_v51, 0.0 }
 0x41f   :  { %v1802_v22 = vpop.f32.mrf.mxu2  ;;  %v1888_v55 = vpop.f32.mrf.mxu3 }
 0x420   :  { %v1803_v33 = vadd.f32 %v1802_v22, %v4695_v14  ;;  %v1884_v14 = vadd.f32 %v1883_v30, %v1795_v60  ;;  %v3240_v30 = vld [vmem:[%s5253_s7 + $0xa4] sm:$0xf0]  ;;  %v3085_v22 = vld [vmem:[%s5253_s7 + $0xb0] sm:$0xf] }
 0x421   :  { %v3078_v4 = vor.u32 %v3240_v30, %v3077_v63 }
 0x425   :  { %2361 = vmatmul.bf16.gmra.mxu0 %v3030_v35  ;;  %v3242_v35 = vld [vmem:[%s5253_s7 + $0xb4] sm:$0xf0] }
 0x427   :  { %v1804_v54 = vpop.f32.mrf.mxu2  ;;  %v1891_v17 = vpop.f32.mrf.mxu3 }
 0x428   :  { %v1805_v15 = vadd.f32 %v1804_v54, %v4663_v8  ;;  %v1892_v8 = vadd.f32 %v1891_v17, %v1803_v33  ;;  %v3225_v54 = vld [vmem:[%s5253_s7 + $0x34] sm:$0xf]  ;;  %v3023_v17 = vld [vmem:[%s5253_s7 + $0x38] sm:$0xf0] }
 0x42a   :  { %v1929_v3 = vmax.f32 %v1892_v8, 0.0 }
 0x42f   :  { %v1893_v31 = vpop.f32.mrf.mxu3  ;;  %v1807_v18 = vpop.f32.mrf.mxu2 }
 0x430   :  { %v1808_v24 = vadd.f32 %v1807_v18, %v4645_v1  ;;  %v1894_v25 = vadd.f32 %v1893_v31, %v1805_v15  ;;  %v1800_v1 = vadd.f32 %v1799_v41, %v4685_v42  ;;  %v1926_v42 = vmax.f32 %v1884_v14, 0.0  ;;  %v3015_v41 = vld [vmem:[%s5253_s7 + $0x28] sm:$0xf0]  ;;  %v3244_v15 = vld [vmem:[%s5253_s7 + $0xc4] sm:$0xf0] }
 0x431   :  { %v3018_v13 = vor.u32 %v3223_v56, %v3015_v41  ;;  %v3086_v31 = vor.u32 %v3242_v35, %v3085_v22  ;;  %v3026_v18 = vor.u32 %v3225_v54, %v3023_v17  ;;  %v3063_v22 = vld [vmem:[%s5253_s7 + $0x88] sm:$0xf0] }
 0x432   :  { %v1889_v39 = vadd.f32 %v1888_v55, %v1800_v1  ;;  %v1930_v0 = vmax.f32 %v1894_v25, 0.0  ;;  %v1977_v61 = vpack.c.bf16 %v1926_v42, %v1925_v36  ;;  %v4972_v55 = vpop.permute.xlu0 %2165  ;;  %v3248_v42 = vld [vmem:[%s5253_s7 + $0xe4] sm:$0xf0]  ;;  %v3047_v36 = vld [vmem:[%s5253_s7 + $0x68] sm:$0xf0] }
 0x434   :  { %v1928_v52 = vmax.f32 %v1889_v39, 0.0  ;;  %v1979_v43 = vpack.c.bf16 %v1930_v0, %v1929_v3  ;;  %v3229_v39 = vld [vmem:[%s5253_s7 + $0x54] sm:$0xf]  ;;  %v3039_v0 = vld [vmem:[%s5253_s7 + $0x58] sm:$0xf0] }
 0x435   :  { %2366 = vmatmul.bf16.gmra.mxu0 %v3038_v23  ;;  %v3042_v60 = vor.u32 %v3229_v39, %v3039_v0 }
 0x436   :  { %v1978_v19 = vpack.c.bf16 %v1928_v52, %v1927_v9 }
 0x437   :  { %v1896_v10 = vpop.f32.mrf.mxu3  ;;  %v1809_v57 = vpop.f32.mrf.mxu2 }
 0x438   :  { %v1810_v20 = vadd.f32 %v1809_v57, %v4683_v28  ;;  %v1897_v47 = vadd.f32 %v1896_v10, %v1808_v24  ;;  %v4991_v57 = vpop.permute.xlu2 %2160  ;;  %v3093_v24 = vld [vmem:[%s5253_s7 + $0xc0] sm:$0xf] }
 0x439   :  { %v3094_v2 = vor.u32 %v3244_v15, %v3093_v24 }
 0x43a   :  { %v1931_v59 = vmax.f32 %v1897_v47, 0.0  ;;  %v4987_v23 = vpop.permute.xlu0 %2080  ;;  %v3031_v47 = vld [vmem:[%s5253_s7 + $0x48] sm:$0xf0] }
 0x43f   :  { %v1898_v48 = vpop.f32.mrf.mxu3 }
 0x440   :  { %v1899_v50 = vadd.f32 %v1898_v48, %v1810_v20  ;;  %v3227_v20 = vld [vmem:[%s5253_s7 + $0x44] sm:$0xf] }
 0x441   :  { %v3034_v48 = vor.u32 %v3227_v20, %v3031_v47 }
 0x442   :  { %v1932_v28 = vmax.f32 %v1899_v50, 0.0  ;;  %v5007_v33 = vpop.permute.xlu0 %2065  ;;  %v5011_v50 = vpop.permute.xlu2 %2145 }
 0x444   :  { %v1980_v58 = vpack.c.bf16 %v1932_v28, %v1931_v59  ;;  %v3101_v59 = vld [vmem:[%s5253_s7 + $0xd0] sm:$0xf] }
 0x445   :  { %2371 = vmatmul.bf16.gmra.mxu0 %v3046_v12  ;;  %v5013_v12 = vpop.permute.xlu1 %2170 }
 0x446   :  { %2422 = vmatpush.bf16.msrb.mxu1 %v1980_v58  ;;  %v3102_v58 = vor.u32 %v3246_v49, %v3101_v59  ;;  %v3237_v49 = vld [vmem:[%s5253_s7 + $0x94] sm:$0xf] }
 0x44a   :  { %2423 = vmatpush.bf16.msrb.mxu1 %v1979_v43  ;;  %v5015_v1 = vpop.permute.xlu0 %2150  ;;  %v5022_v28 = vpop.permute.xlu2 %2060  ;;  %v3109_v43 = vld [vmem:[%s5253_s7 + $0xe0] sm:$0xf] }
 0x44d   :  { %v5033_v51 = vpop.permute.xlu1 %2155 }
 0x44e   :  { %2424 = vmatpush.bf16.msrb.mxu1 %v1978_v19  ;;  %v3231_v19 = vld [vmem:[%s5253_s7 + $0x64] sm:$0xf] }
 0x452   :  { %2425 = vmatpush.bf16.msrb.mxu1 %v1977_v61  ;;  %v5035_v3 = vpop.permute.xlu0 %2135  ;;  %v5039_v52 = vpop.permute.xlu2 %2045  ;;  %v3110_v61 = vor.u32 %v3248_v42, %v3109_v43 }
 0x455   :  { %2376 = vmatmul.bf16.gmra.mxu0 %v3054_v7  ;;  %v5044_v9 = vpop.permute.xlu1 %2070  ;;  %v3050_v7 = vor.u32 %v3231_v19, %v3047_v36 }
 0x456   :  { %2426 = vmatpush.bf16.msrb.mxu1 %v4887_v6  ;;  %v2999_v6 = vld [vmem:[%s5253_s7 + $0x8] sm:$0xf0] }
 0x45a   :  { %2427 = vmatpush.bf16.msrb.mxu1 %v4877_v5  ;;  %v3002_v5 = vor.u32 %v3219_v34, %v2999_v6  ;;  %v5055_v38 = vpop.permute.xlu0 %2050  ;;  %v5059_v44 = vpop.permute.xlu2 %2130 }
 0x45d   :  { %v5061_v11 = vpop.permute.xlu1 %2055 }
 0x45e   :  { %2428 = vmatpush.bf16.msrb.mxu1 %v4867_v29  ;;  %v3069_v29 = vld [vmem:[%s5253_s7 + $0x90] sm:$0xf] }
 0x45f   :  { %v3070_v27 = vor.u32 %v3238_v62, %v3069_v29  ;;  %v3250_v29 = vld [vmem:[%s5253_s7 + $0xf4] sm:$0xf0]  ;;  %v3233_v62 = vld [vmem:[%s5253_s7 + $0x74] sm:$0xf] }
 0x462   :  { %2429 = vmatpush.bf16.msrb.mxu1 %v4854_v16  ;;  %v3010_v16 = vor.u32 %v3221_v40, %v3007_v53  ;;  %v4983_v32 = vpop.f32.mrf.mxu0  ;;  %v2036_v34 = vpop.permute.xlu0 %2035  ;;  %v3055_v40 = vld [vmem:[%s5253_s7 + $0x78] sm:$0xf0] }
 0x465   :  { %2381 = vmatmul.bf16.gmra.mxu0 %v3062_v26  ;;  %2430 = vmatmul.bf16.vlgmr.msrb.gmra.mxu1 %v3002_v5  ;;  %v5065_v26 = vpop.permute.xlu2 %2115  ;;  %v3117_v5 = vld [vmem:[%s5253_s7 + $0xf0] sm:$0xf] }
 0x466   :  { %v3118_v53 = vor.u32 %v3250_v29, %v3117_v5 }
 0x46a   :  { %v4989_v10 = vpop.f32.mrf.mxu0  ;;  %v5081_v63 = vpop.permute.xlu0 %2120 }
 0x46d   :  { %v2031_v56 = vpop.permute.xlu2 %2030 }
 0x472   :  { %v5009_v25 = vpop.f32.mrf.mxu0 }
 0x475   :  { %2386 = vmatmul.bf16.gmra.mxu0 %v3070_v27  ;;  %2435 = vmatmul.bf16.gmra.mxu1 %v3010_v16  ;;  %v3058_v27 = vor.u32 %v3233_v62, %v3055_v40  ;;  %v5079_v16 = vpop.permute.xlu1 %2140  ;;  %v2016_v35 = vpop.permute.xlu2 %2015  ;;  %v3239_v62 = vld [vmem:[%s5253_s7 + $0xa4] sm:$0xf] }
 0x476   :  { %v2343_v54 = vadd.f32 %v4983_v32, %v2016_v35  ;;  %v3071_v32 = vld [vmem:[%s5253_s7 + $0x98] sm:$0xf0] }
 0x477   :  { %v3074_v43 = vor.u32 %v3237_v49, %v3071_v32 }
 0x47a   :  { %v5017_v8 = vpop.f32.mrf.mxu0 }
 0x47b   :  { %v2350_v19 = vadd.f32 %v5017_v8, %v2031_v56 }
 0x47d   :  { %v5083_v41 = vpop.permute.xlu1 %2125 }
 0x482   :  { %v5037_v14 = vpop.f32.mrf.mxu0 }
 0x485   :  { %2391 = vmatmul.bf16.gmra.mxu0 %v3078_v4  ;;  %2440 = vmatmul.bf16.gmra.mxu1 %v3018_v13  ;;  %v5085_v4 = vpop.permute.xlu0 %2105  ;;  %v3235_v13 = vld [vmem:[%s5253_s7 + $0x84] sm:$0xf]  ;;  %v2041_v24 = vpop.permute.xlu1 %2040 }
 0x486   :  { %v3066_v17 = vor.u32 %v3235_v13, %v3063_v22 }
 0x48a   :  { %v5057_v46 = vpop.f32.mrf.mxu0 }
 0x48b   :  { %v2355_v22 = vadd.f32 %v5057_v46, %v2041_v24 }
 0x48d   :  { %v2021_v15 = vpop.permute.xlu0 %2020  ;;  %v2026_v0 = vpop.permute.xlu1 %2025 }
 0x48e   :  { %v2345_v20 = vadd.f32 %v4989_v10, %v2021_v15  ;;  %v3241_v15 = vld [vmem:[%s5253_s7 + $0xb4] sm:$0xf] }
 0x492   :  { %v5063_v6 = vpop.f32.mrf.mxu0 }
 0x495   :  { %2396 = vmatmul.bf16.gmra.mxu0 %v3086_v31  ;;  %2445 = vmatmul.bf16.gmra.mxu1 %v3026_v18 }
 0x49a   :  { %v2359_v30 = vpop.f32.mrf.mxu0 }
 0x4a5   :  { %2401 = vmatmul.bf16.gmra.mxu0 %v3094_v2  ;;  %2450 = vmatmul.bf16.gmra.mxu1 %v3034_v48 }
 0x4b5   :  { %2406 = vmatmul.bf16.gmra.mxu0 %v3102_v58  ;;  %2455 = vmatmul.bf16.gmra.mxu1 %v3042_v60  ;;  %v2362_v58 = vpop.f32.mrf.mxu0  ;;  %v2348_v60 = vadd.f32 %v5009_v25, %v2026_v0  ;;  %v3079_v25 = vld [vmem:[%s5253_s7 + $0xa8] sm:$0xf0] }
 0x4bd   :  { %v5105_v36 = vpop.f32.mrf.mxu0 }
 0x4c5   :  { %2411 = vmatmul.bf16.gmra.mxu0 %v3110_v61  ;;  %2460 = vmatmul.bf16.gmra.mxu1 %v3050_v7  ;;  %v5116_v13 = vpop.f32.mrf.mxu0 }
 0x4d5   :  { %2416 = vmatmul.bf16.gmra.mxu0 %v3118_v53  ;;  %2465 = vmatmul.bf16.gmra.mxu1 %v3058_v27  ;;  %v2353_v53 = vadd.f32 %v5037_v14, %v2036_v34  ;;  %v3082_v27 = vor.u32 %v3239_v62, %v3079_v25  ;;  %v3087_v14 = vld [vmem:[%s5253_s7 + $0xb8] sm:$0xf0]  ;;  %v3247_v25 = vld [vmem:[%s5253_s7 + $0xe4] sm:$0xf] }
 0x4e2   :  { %v2431_v31 = vpop.f32.mrf.mxu1 }
 0x4e3   :  { %v2432_v18 = vadd.f32 %v2431_v31, %v2343_v54 }
 0x4e5   :  { %2470 = vmatmul.bf16.gmra.mxu1 %v3066_v17  ;;  %v2511_v48 = vmax.f32 %v2432_v18, 0.0  ;;  %v2369_v18 = vpop.f32.mrf.mxu0 }
 0x4ea   :  { %v2433_v47 = vpop.f32.mrf.mxu1 }
 0x4eb   :  { %v2434_v2 = vadd.f32 %v2433_v47, %v2345_v20  ;;  %v2358_v20 = vadd.f32 %v5063_v6, %v5039_v52  ;;  %v3090_v47 = vor.u32 %v3241_v15, %v3087_v14  ;;  %v2363_v6 = vadd.f32 %v2362_v58, %v5061_v11 }
 0x4ed   :  { %v2512_v59 = vmax.f32 %v2434_v2, 0.0  ;;  %v2372_v2 = vpop.f32.mrf.mxu0 }
 0x4ef   :  { %v5101_v39 = vpack.c.bf16 %v2512_v59, %v2511_v48  ;;  %v2360_v48 = vadd.f32 %v2359_v30, %v5055_v38 }
 0x4f2   :  { %v2436_v10 = vpop.f32.mrf.mxu1 }
 0x4f3   :  { %v2437_v42 = vadd.f32 %v2436_v10, %v2348_v60  ;;  %v3243_v60 = vld [vmem:[%s5253_s7 + $0xc4] sm:$0xf] }
 0x4f5   :  { %2475 = vmatmul.bf16.gmra.mxu1 %v3074_v43  ;;  %v2513_v5 = vmax.f32 %v2437_v42, 0.0  ;;  %v3095_v43 = vld [vmem:[%s5253_s7 + $0xc8] sm:$0xf0]  ;;  %v2374_v42 = vpop.f32.mrf.mxu0 }
 0x4f6   :  { %v3098_v10 = vor.u32 %v3243_v60, %v3095_v43  ;;  %v2370_v60 = vadd.f32 %v2369_v18, %v5044_v9 }
 0x4fa   :  { %v2438_v61 = vpop.f32.mrf.mxu1 }
 0x4fb   :  { %v2439_v7 = vadd.f32 %v2438_v61, %v2350_v19 }
 0x4fd   :  { %v2514_v29 = vmax.f32 %v2439_v7, 0.0  ;;  %v2377_v61 = vpop.f32.mrf.mxu0  ;;  %v3245_v7 = vld [vmem:[%s5253_s7 + $0xd4] sm:$0xf] }
 0x4ff   :  { %v5113_v40 = vpack.c.bf16 %v2514_v29, %v2513_v5  ;;  %v3103_v5 = vld [vmem:[%s5253_s7 + $0xd8] sm:$0xf0] }
 0x500   :  { %v3106_v29 = vor.u32 %v3245_v7, %v3103_v5  ;;  %v2368_v7 = vadd.f32 %v5116_v13, %v5007_v33  ;;  %v2101_v13 = vpop.permute.xlu2 %2100 }
 0x502   :  { %v2441_v8 = vpop.f32.mrf.mxu1 }
 0x503   :  { %v2442_v56 = vadd.f32 %v2441_v8, %v2353_v53  ;;  %v3111_v53 = vld [vmem:[%s5253_s7 + $0xe8] sm:$0xf0] }
 0x504   :  { %v3114_v8 = vor.u32 %v3247_v25, %v3111_v53 }
 0x505   :  { %2480 = vmatmul.bf16.gmra.mxu1 %v3082_v27  ;;  %v2515_v17 = vmax.f32 %v2442_v56, 0.0  ;;  %v2379_v11 = vpop.f32.mrf.mxu0 }
 0x50a   :  { %v2443_v35 = vpop.f32.mrf.mxu1 }
 0x50b   :  { %v2444_v54 = vadd.f32 %v2443_v35, %v2355_v22 }
 0x50d   :  { %v2516_v31 = vmax.f32 %v2444_v54, 0.0  ;;  %v2382_v27 = vpop.f32.mrf.mxu0  ;;  %v3249_v54 = vld [vmem:[%s5253_s7 + $0xf4] sm:$0xf] }
 0x50f   :  { %v5125_v34 = vpack.c.bf16 %v2516_v31, %v2515_v17  ;;  %v3119_v17 = vld [vmem:[%s5253_s7 + $0xf8] sm:$0xf0] }
 0x510   :  { %v3122_v31 = vor.u32 %v3249_v54, %v3119_v17 }
 0x512   :  { %v2446_v46 = vpop.f32.mrf.mxu1 }
 0x513   :  { %v2447_v24 = vadd.f32 %v2446_v46, %v2358_v20  ;;  %v2111_v20 = vpop.permute.xlu1 %2110  ;;  %v2375_v46 = vadd.f32 %v2374_v42, %v4987_v23 }
 0x515   :  { %2485 = vmatmul.bf16.gmra.mxu1 %v3090_v47  ;;  %v2517_v32 = vmax.f32 %v2447_v24, 0.0  ;;  %v2384_v22 = vpop.f32.mrf.mxu0  ;;  %v2378_v47 = vadd.f32 %v2377_v61, %v5005_v37  ;;  %v2380_v24 = vadd.f32 %v2379_v11, %v4967_v21  ;;  %v2365_v21 = vadd.f32 %v5105_v36, %v5022_v28 }
 0x51a   :  { %v2448_v59 = vpop.f32.mrf.mxu1 }
 0x51b   :  { %v2449_v49 = vadd.f32 %v2448_v59, %v2360_v48  ;;  %v2096_v42 = vpop.permute.xlu1 %2095 }
 0x51c   :  { %v2383_v5 = vadd.f32 %v2382_v27, %v2096_v42 }
 0x51d   :  { %v2518_v0 = vmax.f32 %v2449_v49, 0.0  ;;  %v2387_v14 = vpop.f32.mrf.mxu0  ;;  %v2373_v49 = vadd.f32 %v2372_v2, %v4985_v45 }
 0x51e   :  { %v2388_v17 = vadd.f32 %v2387_v14, %v5085_v4 }
 0x51f   :  { %v5136_v52 = vpack.c.bf16 %v2518_v0, %v2517_v32 }
 0x522   :  { %v2451_v19 = vpop.f32.mrf.mxu1 }
 0x523   :  { %v5139_v38 = vadd.f32 %v2451_v19, %v2363_v6 }
 0x525   :  { %2490 = vmatmul.bf16.gmra.mxu1 %v3098_v10  ;;  %v2389_v19 = vpop.f32.mrf.mxu0 }
 0x52a   :  { %v2453_v30 = vpop.f32.mrf.mxu1 }
 0x52b   :  { %v2454_v9 = vadd.f32 %v2453_v30, %v2365_v21  ;;  %v3141_v21 = vld [vmem:[%s5255_s9 + $0x20] sm:$0xf] }
 0x532   :  { %v2456_v62 = vpop.f32.mrf.mxu1 }
 0x533   :  { %v2457_v45 = vadd.f32 %v2456_v62, %v2368_v7 }
 0x535   :  { %2495 = vmatmul.bf16.gmra.mxu1 %v3106_v29  ;;  %v2521_v53 = vmax.f32 %v2457_v45, 0.0 }
 0x53a   :  { %v2458_v58 = vpop.f32.mrf.mxu1 }
 0x53b   :  { %v2459_v37 = vadd.f32 %v2458_v58, %v2370_v60  ;;  %v2392_v58 = vpop.f32.mrf.mxu0  ;;  %v3133_v60 = vld [vmem:[%s5255_s9 + $0x10] sm:$0xf] }
 0x53d   :  { %v2522_v18 = vmax.f32 %v2459_v37, 0.0 }
 0x53f   :  { %v2556_v33 = vpack.c.bf16 %v2522_v18, %v2521_v53 }
 0x542   :  { %v2461_v56 = vpop.f32.mrf.mxu1 }
 0x543   :  { %v2462_v43 = vadd.f32 %v2461_v56, %v2373_v49  ;;  %v2385_v56 = vadd.f32 %v2384_v22, %v2101_v13  ;;  %v2390_v22 = vadd.f32 %v2389_v19, %v2111_v20  ;;  %v3258_v13 = vld [vmem:[%s5255_s9 + $0x34] sm:$0xf0] }
 0x545   :  { %2500 = vmatmul.bf16.gmra.mxu1 %v3114_v8  ;;  %v2523_v2 = vmax.f32 %v2462_v43, 0.0  ;;  %v2520_v8 = vmax.f32 %v2454_v9, 0.0  ;;  %v3254_v43 = vld [vmem:[%s5255_s9 + $0x14] sm:$0xf0] }
 0x54a   :  { %v2463_v35 = vpop.f32.mrf.mxu1 }
 0x54b   :  { %v2464_v32 = vadd.f32 %v2463_v35, %v2375_v46  ;;  %v2519_v35 = vmax.f32 %v5139_v38, 0.0  ;;  %v3125_v38 = vld [vmem:[%s5255_s9] sm:$0xf]  ;;  %v3252_v46 = vld [vmem:[%s5255_s9 + $0x4] sm:$0xf0] }
 0x54d   :  { %v2524_v61 = vmax.f32 %v2464_v32, 0.0  ;;  %v2555_v36 = vpack.c.bf16 %v2520_v8, %v2519_v35 }
 0x54f   :  { %v2557_v11 = vpack.c.bf16 %v2524_v61, %v2523_v2 }
 0x552   :  { %v2466_v15 = vpop.f32.mrf.mxu1 }
 0x553   :  { %v2467_v48 = vadd.f32 %v2466_v15, %v2378_v47 }
 0x555   :  { %2505 = vmatmul.bf16.gmra.mxu1 %v3122_v31  ;;  %v2525_v6 = vmax.f32 %v2467_v48, 0.0  ;;  %v2394_v31 = vpop.f32.mrf.mxu0 }
 0x55a   :  { %v2468_v59 = vpop.f32.mrf.mxu1 }
 0x55b   :  { %v2469_v0 = vadd.f32 %v2468_v59, %v2380_v24 }
 0x55d   :  { %v2526_v10 = vmax.f32 %v2469_v0, 0.0  ;;  %v2397_v14 = vpop.f32.mrf.mxu0  ;;  %v2395_v0 = vadd.f32 %v2394_v31, %v5081_v63 }
 0x55e   :  { %v2398_v61 = vadd.f32 %v2397_v14, %v5083_v41 }
 0x55f   :  { %v2558_v23 = vpack.c.bf16 %v2526_v10, %v2525_v6  ;;  %v3134_v10 = vor.u32 %v3254_v43, %v3133_v60 }
 0x561   :  { %2655 = vmatpush.bf16.msra.mxu2 %v2558_v23 }
 0x562   :  { %v2471_v29 = vpop.f32.mrf.mxu1 }
 0x563   :  { %v2472_v25 = vadd.f32 %v2471_v29, %v2383_v5  ;;  %v3256_v5 = vld [vmem:[%s5255_s9 + $0x24] sm:$0xf0] }
 0x564   :  { %v3142_v9 = vor.u32 %v3256_v5, %v3141_v21  ;;  %v3151_v21 = vld [vmem:[%s5255_s9 + $0x38] sm:$0xf0] }
 0x565   :  { %2656 = vmatpush.bf16.msra.mxu2 %v2557_v11  ;;  %v2527_v27 = vmax.f32 %v2472_v25, 0.0  ;;  %v2399_v32 = vpop.f32.mrf.mxu0 }
 0x566   :  { %v2400_v42 = vadd.f32 %v2399_v32, %v5059_v44 }
 0x569   :  { %2657 = vmatpush.bf16.msra.mxu2 %v2556_v33  ;;  %v3149_v33 = vld [vmem:[%s5255_s9 + $0x30] sm:$0xf] }
 0x56a   :  { %v2473_v28 = vpop.f32.mrf.mxu1 }
 0x56b   :  { %v2474_v62 = vadd.f32 %v2473_v28, %v2385_v56  ;;  %v3150_v56 = vor.u32 %v3258_v13, %v3149_v33  ;;  %v2588_v13 = vpop.permute.xlu2 %2587 }
 0x56d   :  { %v2528_v54 = vmax.f32 %v2474_v62, 0.0  ;;  %2658 = vmatpush.bf16.msra.mxu2 %v2555_v36 }
 0x56f   :  { %v5169_v30 = vpack.c.bf16 %v2528_v54, %v2527_v27 }
 0x571   :  { %2659 = vmatpush.bf16.msra.mxu2 %v5136_v52  ;;  %v3126_v52 = vor.u32 %v3252_v46, %v3125_v38 }
 0x572   :  { %v2476_v15 = vpop.f32.mrf.mxu1 }
 0x573   :  { %v2477_v47 = vadd.f32 %v2476_v15, %v2388_v17 }
 0x575   :  { %2660 = vmatpush.bf16.msra.mxu2 %v5125_v34  ;;  %v2529_v48 = vmax.f32 %v2477_v47, 0.0 }
 0x579   :  { %2661 = vmatpush.bf16.msra.mxu2 %v5113_v40  ;;  %v2393_v40 = vadd.f32 %v2392_v58, %v5065_v26  ;;  %v2402_v26 = vpop.f32.mrf.mxu0 }
 0x57a   :  { %v2478_v24 = vpop.f32.mrf.mxu1  ;;  %v2403_v41 = vadd.f32 %v2402_v26, %v5035_v3 }
 0x57b   :  { %v2479_v4 = vadd.f32 %v2478_v24, %v2390_v22 }
 0x57d   :  { %v2530_v59 = vmax.f32 %v2479_v4, 0.0  ;;  %2662 = vmatpush.bf16.msra.mxu2 %v5101_v39 }
 0x57f   :  { %v5182_v34 = vpack.c.bf16 %v2530_v59, %v2529_v48 }
 0x580   :  { %2663 = vmatmul.bf16.vlgmr.msra.gmra.mxu2 %v3126_v52 }
 0x581   :  { %v2404_v45 = vpop.f32.mrf.mxu0 }
 0x582   :  { %v2481_v20 = vpop.f32.mrf.mxu1 }
 0x583   :  { %v2482_v49 = vadd.f32 %v2481_v20, %v2393_v40 }
 0x585   :  { %v2531_v19 = vmax.f32 %v2482_v49, 0.0 }
 0x589   :  { %v2407_v8 = vpop.f32.mrf.mxu0 }
 0x58a   :  { %v2483_v6 = vpop.f32.mrf.mxu1  ;;  %v2408_v49 = vadd.f32 %v2407_v8, %v5011_v50  ;;  %v3251_v50 = vld [vmem:[%s5255_s9 + $0x4] sm:$0xf] }
 0x58b   :  { %v2484_v39 = vadd.f32 %v2483_v6, %v2395_v0 }
 0x58d   :  { %v2532_v7 = vmax.f32 %v2484_v39, 0.0 }
 0x58f   :  { %v5192_v37 = vpack.c.bf16 %v2532_v7, %v2531_v19 }
 0x590   :  { %2668 = vmatmul.bf16.gmra.mxu2 %v3134_v10 }
 0x591   :  { %v2409_v35 = vpop.f32.mrf.mxu0 }
 0x592   :  { %v2486_v63 = vpop.f32.mrf.mxu1  ;;  %v2410_v48 = vadd.f32 %v2409_v35, %v5015_v1 }
 0x593   :  { %v2487_v23 = vadd.f32 %v2486_v63, %v2398_v61  ;;  %v3253_v61 = vld [vmem:[%s5255_s9 + $0x14] sm:$0xf]  ;;  %v3255_v63 = vld [vmem:[%s5255_s9 + $0x24] sm:$0xf] }
 0x595   :  { %v2533_v18 = vmax.f32 %v2487_v23, 0.0  ;;  %v3143_v23 = vld [vmem:[%s5255_s9 + $0x28] sm:$0xf0] }
 0x599   :  { %v2412_v36 = vpop.f32.mrf.mxu0 }
 0x59a   :  { %v2488_v2 = vpop.f32.mrf.mxu1  ;;  %v2413_v4 = vadd.f32 %v2412_v36, %v5033_v51 }
 0x59b   :  { %v2489_v29 = vadd.f32 %v2488_v2, %v2400_v42  ;;  %v3257_v42 = vld [vmem:[%s5255_s9 + $0x34] sm:$0xf] }
 0x59c   :  { %v3154_v5 = vor.u32 %v3257_v42, %v3151_v21 }
 0x59d   :  { %v2534_v11 = vmax.f32 %v2489_v29, 0.0  ;;  %v2578_v29 = vpop.permute.xlu0 %2577 }
 0x59f   :  { %v2562_v25 = vpack.c.bf16 %v2534_v11, %v2533_v18 }
 0x5a0   :  { %2673 = vmatmul.bf16.gmra.mxu2 %v3142_v9 }
 0x5a1   :  { %v2414_v27 = vpop.f32.mrf.mxu0 }
 0x5a2   :  { %v2491_v53 = vpop.f32.mrf.mxu1  ;;  %v2415_v22 = vadd.f32 %v2414_v27, %v4991_v57  ;;  %v2405_v57 = vadd.f32 %v2404_v45, %v5079_v16  ;;  %v3127_v16 = vld [vmem:[%s5255_s9 + $0x8] sm:$0xf0] }
 0x5a3   :  { %v2492_v44 = vadd.f32 %v2491_v53, %v2403_v41  ;;  %v3130_v26 = vor.u32 %v3251_v50, %v3127_v16  ;;  %v2583_v41 = vpop.permute.xlu1 %2582 }
 0x5a5   :  { %v2535_v19 = vmax.f32 %v2492_v44, 0.0 }
 0x5a9   :  { %v2417_v17 = vpop.f32.mrf.mxu0 }
 0x5aa   :  { %v2493_v58 = vpop.f32.mrf.mxu1  ;;  %v2418_v47 = vadd.f32 %v2417_v17, %v4972_v55 }
 0x5ab   :  { %v2494_v43 = vadd.f32 %v2493_v58, %v2405_v57 }
 0x5ad   :  { %v2536_v10 = vmax.f32 %v2494_v43, 0.0 }
 0x5af   :  { %v2563_v7 = vpack.c.bf16 %v2536_v10, %v2535_v19 }
 0x5b0   :  { %2678 = vmatmul.bf16.gmra.mxu2 %v3150_v56 }
 0x5b1   :  { %v2419_v15 = vpop.f32.mrf.mxu0 }
 0x5b2   :  { %v2496_v28 = vpop.f32.mrf.mxu1  ;;  %v2420_v38 = vadd.f32 %v2419_v15, %v5013_v12 }
 0x5b3   :  { %v2497_v60 = vadd.f32 %v2496_v28, %v2408_v49  ;;  %v2593_v28 = vpop.permute.xlu0 %2592 }
 0x5b5   :  { %v2537_v39 = vmax.f32 %v2497_v60, 0.0 }
 0x5ba   :  { %v2498_v62 = vpop.f32.mrf.mxu1 }
 0x5bb   :  { %v2499_v32 = vadd.f32 %v2498_v62, %v2410_v48 }
 0x5bd   :  { %v2538_v6 = vmax.f32 %v2499_v32, 0.0 }
 0x5bf   :  { %v2564_v1 = vpack.c.bf16 %v2538_v6, %v2537_v39 }
 0x5c2   :  { %v2501_v3 = vpop.f32.mrf.mxu1 }
 0x5c3   :  { %v2502_v59 = vadd.f32 %v2501_v3, %v2413_v4 }
 0x5c5   :  { %v2539_v12 = vmax.f32 %v2502_v59, 0.0 }
 0x5ca   :  { %v2503_v54 = vpop.f32.mrf.mxu1 }
 0x5cb   :  { %v2504_v14 = vadd.f32 %v2503_v54, %v2415_v22  ;;  %v2598_v54 = vpop.permute.xlu1 %2597  ;;  %v2603_v22 = vpop.permute.xlu2 %2602 }
 0x5cd   :  { %v2540_v0 = vmax.f32 %v2504_v14, 0.0  ;;  %v2608_v14 = vpop.permute.xlu0 %2607 }
 0x5cf   :  { %v2565_v51 = vpack.c.bf16 %v2540_v0, %v2539_v12 }
 0x5d2   :  { %v2506_v31 = vpop.f32.mrf.mxu1 }
 0x5d3   :  { %v2507_v46 = vadd.f32 %v2506_v31, %v2418_v47 }
 0x5d5   :  { %v2541_v40 = vmax.f32 %v2507_v46, 0.0 }
 0x5da   :  { %v2508_v24 = vpop.f32.mrf.mxu1 }
 0x5db   :  { %v2509_v52 = vadd.f32 %v2508_v24, %v2420_v38 }
 0x5dd   :  { %v2542_v20 = vmax.f32 %v2509_v52, 0.0 }
 0x5df   :  { %v2566_v55 = vpack.c.bf16 %v2542_v20, %v2541_v40  ;;  %v2613_v20 = vpop.permute.xlu1 %2612 }
 0x5e1   :  { %2684 = vmatpush.bf16.msra.mxu3 %v2566_v55 }
 0x5e5   :  { %2685 = vmatpush.bf16.msra.mxu3 %v2565_v51 }
 0x5e9   :  { %2686 = vmatpush.bf16.msra.mxu3 %v2564_v1 }
 0x5ed   :  { %2687 = vmatpush.bf16.msra.mxu3 %v2563_v7 }
 0x5f1   :  { %2688 = vmatpush.bf16.msra.mxu3 %v2562_v25 }
 0x5f5   :  { %2689 = vmatpush.bf16.msra.mxu3 %v5192_v37 }
 0x5f9   :  { %2690 = vmatpush.bf16.msra.mxu3 %v5182_v34  ;;  %v3135_v34 = vld [vmem:[%s5255_s9 + $0x18] sm:$0xf0]  ;;  %s3361_s9 = smov [#allocation2]  }
 0x5fa   :  { %v3138_v37 = vor.u32 %v3253_v61, %v3135_v34  ;;  %s2725_s29 = sshll.u32 %s3361_s9, 4  ;;  %s2726_s29 = int_to_ptr.vmem [resolvable:$true] %s2725_s29 }
 0x5fd   :  { %2691 = vmatpush.bf16.msra.mxu3 %v5169_v30  ;;  %v3146_v30 = vor.u32 %v3255_v63, %v3143_v23 }
 0x600   :  { %2692 = vmatmul.bf16.vlgmr.msra.gmra.mxu3 %v3130_v26 }
 0x603   :  { %v2664_v45 = vpop.f32.mrf.mxu2 }
 0x604   :  { %v2665_v9 = vadd.f32 %v2664_v45, %v2578_v29 }
 0x60b   :  { %v2666_v2 = vpop.f32.mrf.mxu2 }
 0x60c   :  { %v2667_v53 = vadd.f32 %v2666_v2, %v2583_v41 }
 0x610   :  { %2697 = vmatmul.bf16.gmra.mxu3 %v3138_v37 }
 0x613   :  { %v2669_v25 = vpop.f32.mrf.mxu2 }
 0x614   :  { %v2670_v58 = vadd.f32 %v2669_v25, %v2588_v13 }
 0x61b   :  { %v2671_v33 = vpop.f32.mrf.mxu2 }
 0x61c   :  { %v2672_v62 = vadd.f32 %v2671_v33, %v2593_v28 }
 0x620   :  { %2702 = vmatmul.bf16.gmra.mxu3 %v3146_v30 }
 0x623   :  { %v2674_v36 = vpop.f32.mrf.mxu2 }
 0x624   :  { %v2675_v17 = vadd.f32 %v2674_v36, %v2598_v54 }
 0x62b   :  { %v2676_v31 = vpop.f32.mrf.mxu2 }
 0x62c   :  { %v2677_v38 = vadd.f32 %v2676_v31, %v2603_v22 }
 0x630   :  { %2707 = vmatmul.bf16.gmra.mxu3 %v3154_v5 }
 0x633   :  { %v2679_v4 = vpop.f32.mrf.mxu2 }
 0x634   :  { %v2680_v52 = vadd.f32 %v2679_v4, %v2608_v14 }
 0x63b   :  { %v2681_v40 = vpop.f32.mrf.mxu2 }
 0x63c   :  { %v2682_v49 = vadd.f32 %v2681_v40, %v2613_v20 }
 0x683   :  { %v2693_v18 = vpop.f32.mrf.mxu3 }
 0x684   :  { %v2694_v11 = vadd.f32 %v2693_v18, %v2665_v9 }
 0x686   :  { %2713 = vst [vmem:[#allocation2] sm:$0xff] %v2694_v11 }
 0x68b   :  { %v2695_v44 = vpop.f32.mrf.mxu3 }
 0x68c   :  { %v2696_v8 = vadd.f32 %v2695_v44, %v2667_v53 }
 0x68e   :  { %2714 = vst [vmem:[#allocation2 + $0x8] sm:$0xff] %v2696_v8 }
 0x693   :  { %v2698_v56 = vpop.f32.mrf.mxu3 }
 0x694   :  { %v2699_v35 = vadd.f32 %v2698_v56, %v2670_v58 }
 0x696   :  { %2715 = vst [vmem:[#allocation2 + $0x10] sm:$0xff] %v2699_v35 }
 0x69b   :  { %v2700_v27 = vpop.f32.mrf.mxu3 }
 0x69c   :  { %v2701_v3 = vadd.f32 %v2700_v27, %v2672_v62 }
 0x69e   :  { %2716 = vst [vmem:[#allocation2 + $0x18] sm:$0xff] %v2701_v3 }
 0x6a3   :  { %v2703_v15 = vpop.f32.mrf.mxu3 }
 0x6a4   :  { %v2704_v47 = vadd.f32 %v2703_v15, %v2675_v17 }
 0x6a6   :  { %2717 = vst [vmem:[#allocation2 + $0x20] sm:$0xff] %v2704_v47 }
 0x6ab   :  { %v2705_v46 = vpop.f32.mrf.mxu3 }
 0x6ac   :  { %v2706_v24 = vadd.f32 %v2705_v46, %v2677_v38 }
 0x6ae   :  { %2718 = vst [vmem:[#allocation2 + $0x28] sm:$0xff] %v2706_v24 }
 0x6b3   :  { %v2708_v48 = vpop.f32.mrf.mxu3 }
 0x6b4   :  { %v2709_v59 = vadd.f32 %v2708_v48, %v2680_v52 }
 0x6b6   :  { %2719 = vst [vmem:[#allocation2 + $0x30] sm:$0xff] %v2709_v59 }
 0x6bb   :  { %v2710_v32 = vpop.f32.mrf.mxu3 }
 0x6bc   :  { %v2711_v0 = vadd.f32 %v2710_v32, %v2682_v49 }
 0x6be   :  { %2720 = vst [vmem:[#allocation2 + $0x38] sm:$0xff] %v2711_v0 }
 0x6bf   :  { %2733 = dma.vmem_to_hbm [thread:$0]  %s2726_s29, 1024, %s2728_s12, [#allocation3], %s3362_s13, %s3362_s13, %s3363_s2  }
 0x6c0   :  { %3357 = dma.done.wait [#allocation3], 1024  }
 0x6c1   :  { %3358 = vsyncadd [#allocation3], 4294966272 }
 0x6c2   :  { %2738 = vsyncpa [#allocation3], 1 }

</bundles_post_ra>
